<compile_context>
chip_gen: v6e
topology: v6e:2x2x1
jax: 0.10.0
libtpu: 0.0.40
codegen_flags: <defaults>
</compile_context>

<pallas_src>
import functools

import jax
import jax.numpy as jnp
from jax.experimental import pallas as pl
from jax.experimental.pallas import tpu as pltpu


def _context_flow_kernel(x_ref, wdw_ref, wpw_ref, bias_ref, o_ref, xpad_ref,
                         *, H, W, K, C_in, C_out, pad_beg):
    # x_ref    : (1, C_in, H, W)        one image, channel-major (matches NCHW)
    # wdw_ref  : (K*K, C_in, 1, 1)      depthwise filter with BN scale folded in
    # wpw_ref  : (C_in, C_out, 1, 1)    pointwise weight (transposed)
    # bias_ref : (C_out, 1, 1)          BN shift folded through the pointwise conv
    # o_ref    : (1, C_out, H, W)
    # xpad_ref : (C_in, H+K-1, W+K-1)   VMEM scratch: zero halo + image interior

    # fixed_padding built in VMEM (no HBM-level jnp.pad copy in the wrapper).
    xpad_ref[...] = jnp.zeros_like(xpad_ref)
    xpad_ref[:, pad_beg:pad_beg + H, pad_beg:pad_beg + W] = x_ref[0].astype(jnp.float32)

    # Depthwise KxK conv: K*K shifted broadcast-MACs on the VPU, vectorized over C_in.
    acc = jnp.zeros((C_in, H, W), jnp.float32)
    for dy in range(K):
        for dx in range(K):
            acc = acc + xpad_ref[:, dy:dy + H, dx:dx + W] * wdw_ref[dy * K + dx]

    # Pointwise 1x1 conv (BN already folded): C_in broadcast-MACs on the VPU.
    # (MXU skipped on purpose: a (C_out=8, C_in=4) contraction fills <4% of the array.)
    y = jnp.zeros((C_out, H, W), jnp.float32)
    for ci in range(C_in):
        y = y + acc[ci:ci + 1] * wpw_ref[ci]

    y = jnp.maximum(y + bias_ref[...], 0.0)          # + folded-BN bias, ReLU
    o_ref[0] = y.astype(o_ref.dtype)


def context_flow_pallas(x_nchw, w_dw, gamma, beta, run_mean, run_var, w_pw, eps=1e-5):
    """x_nchw: (N, C_in, H, W) float32. Returns (N, C_out, H, W) float32."""
    N, C_in, H, W = x_nchw.shape
    K = w_dw.shape[-1]                  # PyTorch depthwise weight: (C_in, 1, K, K)
    C_out = w_pw.shape[0]               # PyTorch pointwise weight: (C_out, C_in, 1, 1)
    dilation = 1

    # fixed_padding geometry (kernel_size=K, dilation=1).
    k_eff = K + (K - 1) * (dilation - 1)
    pad_total = k_eff - 1
    pad_beg = pad_total // 2
    Hp, Wp = H + pad_total, W + pad_total

    # Fold inference-mode BatchNorm into the weights (done in f32 on the host).
    scale = gamma / jnp.sqrt(run_var + eps)                     # (C_in,)
    shift = beta - run_mean * scale                             # (C_in,)

    wdw_f = w_dw[:, 0, :, :] * scale[:, None, None]             # (C_in, K, K), scale folded
    wdw = jnp.transpose(wdw_f, (1, 2, 0)).reshape(K * K, C_in)[:, :, None, None]

    wpw2d = w_pw[:, :, 0, 0]                                    # (C_out, C_in)
    wpw = jnp.transpose(wpw2d, (1, 0))[:, :, None, None]        # (C_in, C_out, 1, 1)
    bias = (wpw2d @ shift)[:, None, None]                       # (C_out, 1, 1)

    kernel = functools.partial(_context_flow_kernel, H=H, W=W, K=K,
                               C_in=C_in, C_out=C_out, pad_beg=pad_beg)

    return pl.pallas_call(
        kernel,
        out_shape=jax.ShapeDtypeStruct((N, C_out, H, W), jnp.float32),
        grid_spec=pltpu.PrefetchScalarGridSpec(
            num_scalar_prefetch=0,
            grid=(N,),
            in_specs=[
                pl.BlockSpec((1, C_in, H, W), lambda n: (n, 0, 0, 0)),
                pl.BlockSpec((K * K, C_in, 1, 1), lambda n: (0, 0, 0, 0)),
                pl.BlockSpec((C_in, C_out, 1, 1), lambda n: (0, 0, 0, 0)),
                pl.BlockSpec((C_out, 1, 1), lambda n: (0, 0, 0)),
            ],
            out_specs=pl.BlockSpec((1, C_out, H, W), lambda n: (n, 0, 0, 0)),
            scratch_shapes=[pltpu.VMEM((C_in, Hp, Wp), jnp.float32)],
        ),
        compiler_params=pltpu.CompilerParams(dimension_semantics=("parallel",)),
    )(x_nchw, wdw, wpw, bias)


def _reference(x, w_dw, gamma, beta, run_mean, run_var, w_pw, eps=1e-5):
    """Pure-JAX reference (general K, same math as the PyTorch module, BN inference)."""
    N, C_in, H, W = x.shape
    K = w_dw.shape[-1]
    pad_total = K - 1
    pb = pad_total // 2
    pe = pad_total - pb
    xp = jnp.pad(x, ((0, 0), (0, 0), (pb, pe), (pb, pe)))
    acc = jnp.zeros((N, C_in, H, W), jnp.float32)
    for dy in range(K):
        for dx in range(K):
            acc = acc + xp[:, :, dy:dy + H, dx:dx + W] * w_dw[:, 0, dy, dx][None, :, None, None]
    scale = gamma / jnp.sqrt(run_var + eps)
    shift = beta - run_mean * scale
    acc = acc * scale[None, :, None, None] + shift[None, :, None, None]
    y = jnp.einsum("nchw,dc->ndhw", acc, w_pw[:, :, 0, 0])
    return jnp.maximum(y, 0.0)


if __name__ == "__main__":
    # Small shapes: batch=2, inplanes=4, planes=8, spatial=16x16.
    N, C_in, C_out, H, W, K = 2, 4, 8, 16, 16, 3

    key = jax.random.PRNGKey(0)
    kx, kdw, kpw, kg, kb, km, kv = jax.random.split(key, 7)

    x = jax.random.normal(kx, (N, C_in, H, W), jnp.float32)
    w_dw = jax.random.normal(kdw, (C_in, 1, K, K), jnp.float32) * 0.1      # depthwise weight
    w_pw = jax.random.normal(kpw, (C_out, C_in, 1, 1), jnp.float32) * 0.1  # pointwise weight
    gamma = 1.0 + 0.1 * jax.random.normal(kg, (C_in,), jnp.float32)
    beta = 0.1 * jax.random.normal(kb, (C_in,), jnp.float32)
    run_mean = 0.1 * jax.random.normal(km, (C_in,), jnp.float32)
    run_var = jnp.abs(1.0 + 0.1 * jax.random.normal(kv, (C_in,), jnp.float32))
    # NOTE: BatchNorm is evaluated in inference mode (running stats), the standard
    # deployment semantics for this block; it is folded exactly into the weights.

    out = context_flow_pallas(x, w_dw, gamma, beta, run_mean, run_var, w_pw)
    out = jax.block_until_ready(out)

    ref = _reference(x, w_dw, gamma, beta, run_mean, run_var, w_pw)
    assert out.shape == (N, C_out, H, W)
    assert jnp.allclose(out, ref, atol=1e-4, rtol=1e-4), "mismatch vs reference"

    print("KERNEL_OK")
</pallas_src>

<mosaic_0001>
module attributes {stable_mosaic.version = 11 : i64} {
  func.func @_context_flow_kernel(%arg0: i32, %arg1: memref<1x4x16x16xf32, #tpu.memory_space<vmem>>, %arg2: memref<9x4x1x1xf32, #tpu.memory_space<vmem>>, %arg3: memref<4x8x1x1xf32, #tpu.memory_space<vmem>>, %arg4: memref<8x1x1xf32, #tpu.memory_space<vmem>>, %arg5: memref<1x8x16x16xf32, #tpu.memory_space<vmem>>, %arg6: memref<4x18x18xf32, #tpu.memory_space<vmem>>) attributes {dimension_semantics = [#tpu.dimension_semantics<parallel>], iteration_bounds = array<i64: 2>, scalar_prefetch = 0 : i64, scratch_operands = 1 : i64, tpu.core_type = #tpu.core_type<tc>, window_params = [{transform_indices = @transform_0, window_bounds = array<i64: 1, 4, 16, 16>}, {pipeline_mode = #tpu.pipeline_mode<synchronous>, transform_indices = @transform_1, window_bounds = array<i64: 9, 4, 1, 1>}, {pipeline_mode = #tpu.pipeline_mode<synchronous>, transform_indices = @transform_2, window_bounds = array<i64: 4, 8, 1, 1>}, {pipeline_mode = #tpu.pipeline_mode<synchronous>, transform_indices = @transform_3, window_bounds = array<i64: 8, 1, 1>}, {transform_indices = @transform_4, window_bounds = array<i64: 1, 8, 16, 16>}]} {
    %cst = arith.constant 0.000000e+00 : f32
    %0 = vector.broadcast %cst : f32 to vector<4x18x18xf32>
    %c0 = arith.constant 0 : index
    %c0_0 = arith.constant 0 : index
    %c0_1 = arith.constant 0 : index
    %1 = vector.load %arg6[%c0, %c0_0, %c0_1] : memref<4x18x18xf32, #tpu.memory_space<vmem>>, vector<4x18x18xf32>
    tpu.vector_store %arg6[%c0, %c0_0, %c0_1], %0 {strides = array<i32>} : memref<4x18x18xf32, #tpu.memory_space<vmem>>, vector<4x18x18xf32>,
    %c0_2 = arith.constant 0 : index
    %c0_3 = arith.constant 0 : index
    %c0_4 = arith.constant 0 : index
    %c0_5 = arith.constant 0 : index
    %2 = vector.load %arg1[%c0_2, %c0_3, %c0_4, %c0_5] : memref<1x4x16x16xf32, #tpu.memory_space<vmem>>, vector<1x4x16x16xf32>
    %3 = vector.shape_cast %2 : vector<1x4x16x16xf32> to vector<4x16x16xf32>
    %c0_6 = arith.constant 0 : index
    %c1 = arith.constant 1 : index
    %c1_7 = arith.constant 1 : index
    %4 = vector.load %arg6[%c0_6, %c1, %c1_7] : memref<4x18x18xf32, #tpu.memory_space<vmem>>, vector<4x16x16xf32>
    tpu.vector_store %arg6[%c0_6, %c1, %c1_7], %3 {strides = array<i32>} : memref<4x18x18xf32, #tpu.memory_space<vmem>>, vector<4x16x16xf32>,
    %cst_8 = arith.constant 0.000000e+00 : f32
    %5 = vector.broadcast %cst_8 : f32 to vector<4x16x16xf32>
    %c0_9 = arith.constant 0 : index
    %c0_10 = arith.constant 0 : index
    %c0_11 = arith.constant 0 : index
    %6 = vector.load %arg6[%c0_9, %c0_10, %c0_11] : memref<4x18x18xf32, #tpu.memory_space<vmem>>, vector<4x16x16xf32>
    %c0_12 = arith.constant 0 : index
    %c0_13 = arith.constant 0 : index
    %c0_14 = arith.constant 0 : index
    %c0_15 = arith.constant 0 : index
    %7 = vector.load %arg2[%c0_12, %c0_13, %c0_14, %c0_15] : memref<9x4x1x1xf32, #tpu.memory_space<vmem>>, vector<1x4x1x1xf32>
    %8 = vector.shape_cast %7 : vector<1x4x1x1xf32> to vector<4x1x1xf32>
    %9 = vector.broadcast %8 : vector<4x1x1xf32> to vector<4x16x16xf32>
    %10 = arith.mulf %6, %9 : vector<4x16x16xf32>
    %11 = arith.addf %5, %10 : vector<4x16x16xf32>
    %c0_16 = arith.constant 0 : index
    %c0_17 = arith.constant 0 : index
    %c1_18 = arith.constant 1 : index
    %12 = vector.load %arg6[%c0_16, %c0_17, %c1_18] : memref<4x18x18xf32, #tpu.memory_space<vmem>>, vector<4x16x16xf32>
    %c1_19 = arith.constant 1 : index
    %c0_20 = arith.constant 0 : index
    %c0_21 = arith.constant 0 : index
    %c0_22 = arith.constant 0 : index
    %13 = vector.load %arg2[%c1_19, %c0_20, %c0_21, %c0_22] : memref<9x4x1x1xf32, #tpu.memory_space<vmem>>, vector<1x4x1x1xf32>
    %14 = vector.shape_cast %13 : vector<1x4x1x1xf32> to vector<4x1x1xf32>
    %15 = vector.broadcast %14 : vector<4x1x1xf32> to vector<4x16x16xf32>
    %16 = arith.mulf %12, %15 : vector<4x16x16xf32>
    %17 = arith.addf %11, %16 : vector<4x16x16xf32>
    %c0_23 = arith.constant 0 : index
    %c0_24 = arith.constant 0 : index
    %c2 = arith.constant 2 : index
    %18 = vector.load %arg6[%c0_23, %c0_24, %c2] : memref<4x18x18xf32, #tpu.memory_space<vmem>>, vector<4x16x16xf32>
    %c2_25 = arith.constant 2 : index
    %c0_26 = arith.constant 0 : index
    %c0_27 = arith.constant 0 : index
    %c0_28 = arith.constant 0 : index
    %19 = vector.load %arg2[%c2_25, %c0_26, %c0_27, %c0_28] : memref<9x4x1x1xf32, #tpu.memory_space<vmem>>, vector<1x4x1x1xf32>
    %20 = vector.shape_cast %19 : vector<1x4x1x1xf32> to vector<4x1x1xf32>
    %21 = vector.broadcast %20 : vector<4x1x1xf32> to vector<4x16x16xf32>
    %22 = arith.mulf %18, %21 : vector<4x16x16xf32>
    %23 = arith.addf %17, %22 : vector<4x16x16xf32>
    %c0_29 = arith.constant 0 : index
    %c1_30 = arith.constant 1 : index
    %c0_31 = arith.constant 0 : index
    %24 = vector.load %arg6[%c0_29, %c1_30, %c0_31] : memref<4x18x18xf32, #tpu.memory_space<vmem>>, vector<4x16x16xf32>
    %c3 = arith.constant 3 : index
    %c0_32 = arith.constant 0 : index
    %c0_33 = arith.constant 0 : index
    %c0_34 = arith.constant 0 : index
    %25 = vector.load %arg2[%c3, %c0_32, %c0_33, %c0_34] : memref<9x4x1x1xf32, #tpu.memory_space<vmem>>, vector<1x4x1x1xf32>
    %26 = vector.shape_cast %25 : vector<1x4x1x1xf32> to vector<4x1x1xf32>
    %27 = vector.broadcast %26 : vector<4x1x1xf32> to vector<4x16x16xf32>
    %28 = arith.mulf %24, %27 : vector<4x16x16xf32>
    %29 = arith.addf %23, %28 : vector<4x16x16xf32>
    %c0_35 = arith.constant 0 : index
    %c1_36 = arith.constant 1 : index
    %c1_37 = arith.constant 1 : index
    %30 = vector.load %arg6[%c0_35, %c1_36, %c1_37] : memref<4x18x18xf32, #tpu.memory_space<vmem>>, vector<4x16x16xf32>
    %c4 = arith.constant 4 : index
    %c0_38 = arith.constant 0 : index
    %c0_39 = arith.constant 0 : index
    %c0_40 = arith.constant 0 : index
    %31 = vector.load %arg2[%c4, %c0_38, %c0_39, %c0_40] : memref<9x4x1x1xf32, #tpu.memory_space<vmem>>, vector<1x4x1x1xf32>
    %32 = vector.shape_cast %31 : vector<1x4x1x1xf32> to vector<4x1x1xf32>
    %33 = vector.broadcast %32 : vector<4x1x1xf32> to vector<4x16x16xf32>
    %34 = arith.mulf %30, %33 : vector<4x16x16xf32>
    %35 = arith.addf %29, %34 : vector<4x16x16xf32>
    %c0_41 = arith.constant 0 : index
    %c1_42 = arith.constant 1 : index
    %c2_43 = arith.constant 2 : index
    %36 = vector.load %arg6[%c0_41, %c1_42, %c2_43] : memref<4x18x18xf32, #tpu.memory_space<vmem>>, vector<4x16x16xf32>
    %c5 = arith.constant 5 : index
    %c0_44 = arith.constant 0 : index
    %c0_45 = arith.constant 0 : index
    %c0_46 = arith.constant 0 : index
    %37 = vector.load %arg2[%c5, %c0_44, %c0_45, %c0_46] : memref<9x4x1x1xf32, #tpu.memory_space<vmem>>, vector<1x4x1x1xf32>
    %38 = vector.shape_cast %37 : vector<1x4x1x1xf32> to vector<4x1x1xf32>
    %39 = vector.broadcast %38 : vector<4x1x1xf32> to vector<4x16x16xf32>
    %40 = arith.mulf %36, %39 : vector<4x16x16xf32>
    %41 = arith.addf %35, %40 : vector<4x16x16xf32>
    %c0_47 = arith.constant 0 : index
    %c2_48 = arith.constant 2 : index
    %c0_49 = arith.constant 0 : index
    %42 = vector.load %arg6[%c0_47, %c2_48, %c0_49] : memref<4x18x18xf32, #tpu.memory_space<vmem>>, vector<4x16x16xf32>
    %c6 = arith.constant 6 : index
    %c0_50 = arith.constant 0 : index
    %c0_51 = arith.constant 0 : index
    %c0_52 = arith.constant 0 : index
    %43 = vector.load %arg2[%c6, %c0_50, %c0_51, %c0_52] : memref<9x4x1x1xf32, #tpu.memory_space<vmem>>, vector<1x4x1x1xf32>
    %44 = vector.shape_cast %43 : vector<1x4x1x1xf32> to vector<4x1x1xf32>
    %45 = vector.broadcast %44 : vector<4x1x1xf32> to vector<4x16x16xf32>
    %46 = arith.mulf %42, %45 : vector<4x16x16xf32>
    %47 = arith.addf %41, %46 : vector<4x16x16xf32>
    %c0_53 = arith.constant 0 : index
    %c2_54 = arith.constant 2 : index
    %c1_55 = arith.constant 1 : index
    %48 = vector.load %arg6[%c0_53, %c2_54, %c1_55] : memref<4x18x18xf32, #tpu.memory_space<vmem>>, vector<4x16x16xf32>
    %c7 = arith.constant 7 : index
    %c0_56 = arith.constant 0 : index
    %c0_57 = arith.constant 0 : index
    %c0_58 = arith.constant 0 : index
    %49 = vector.load %arg2[%c7, %c0_56, %c0_57, %c0_58] : memref<9x4x1x1xf32, #tpu.memory_space<vmem>>, vector<1x4x1x1xf32>
    %50 = vector.shape_cast %49 : vector<1x4x1x1xf32> to vector<4x1x1xf32>
    %51 = vector.broadcast %50 : vector<4x1x1xf32> to vector<4x16x16xf32>
    %52 = arith.mulf %48, %51 : vector<4x16x16xf32>
    %53 = arith.addf %47, %52 : vector<4x16x16xf32>
    %c0_59 = arith.constant 0 : index
    %c2_60 = arith.constant 2 : index
    %c2_61 = arith.constant 2 : index
    %54 = vector.load %arg6[%c0_59, %c2_60, %c2_61] : memref<4x18x18xf32, #tpu.memory_space<vmem>>, vector<4x16x16xf32>
    %c8 = arith.constant 8 : index
    %c0_62 = arith.constant 0 : index
    %c0_63 = arith.constant 0 : index
    %c0_64 = arith.constant 0 : index
    %55 = vector.load %arg2[%c8, %c0_62, %c0_63, %c0_64] : memref<9x4x1x1xf32, #tpu.memory_space<vmem>>, vector<1x4x1x1xf32>
    %56 = vector.shape_cast %55 : vector<1x4x1x1xf32> to vector<4x1x1xf32>
    %57 = vector.broadcast %56 : vector<4x1x1xf32> to vector<4x16x16xf32>
    %58 = arith.mulf %54, %57 : vector<4x16x16xf32>
    %59 = arith.addf %53, %58 : vector<4x16x16xf32>
    %cst_65 = arith.constant 0.000000e+00 : f32
    %60 = vector.broadcast %cst_65 : f32 to vector<8x16x16xf32>
    %61 = vector.extract_strided_slice %59 {offsets = [0, 0, 0], sizes = [1, 16, 16], strides = [1, 1, 1]} : vector<4x16x16xf32> to vector<1x16x16xf32>
    %c0_66 = arith.constant 0 : index
    %c0_67 = arith.constant 0 : index
    %c0_68 = arith.constant 0 : index
    %c0_69 = arith.constant 0 : index
    %62 = vector.load %arg3[%c0_66, %c0_67, %c0_68, %c0_69] : memref<4x8x1x1xf32, #tpu.memory_space<vmem>>, vector<1x8x1x1xf32>
    %63 = vector.shape_cast %62 : vector<1x8x1x1xf32> to vector<8x1x1xf32>
    %64 = vector.broadcast %61 : vector<1x16x16xf32> to vector<8x16x16xf32>
    %65 = vector.broadcast %63 : vector<8x1x1xf32> to vector<8x16x16xf32>
    %66 = arith.mulf %64, %65 : vector<8x16x16xf32>
    %67 = arith.addf %60, %66 : vector<8x16x16xf32>
    %68 = vector.extract_strided_slice %59 {offsets = [1, 0, 0], sizes = [1, 16, 16], strides = [1, 1, 1]} : vector<4x16x16xf32> to vector<1x16x16xf32>
    %c1_70 = arith.constant 1 : index
    %c0_71 = arith.constant 0 : index
    %c0_72 = arith.constant 0 : index
    %c0_73 = arith.constant 0 : index
    %69 = vector.load %arg3[%c1_70, %c0_71, %c0_72, %c0_73] : memref<4x8x1x1xf32, #tpu.memory_space<vmem>>, vector<1x8x1x1xf32>
    %70 = vector.shape_cast %69 : vector<1x8x1x1xf32> to vector<8x1x1xf32>
    %71 = vector.broadcast %68 : vector<1x16x16xf32> to vector<8x16x16xf32>
    %72 = vector.broadcast %70 : vector<8x1x1xf32> to vector<8x16x16xf32>
    %73 = arith.mulf %71, %72 : vector<8x16x16xf32>
    %74 = arith.addf %67, %73 : vector<8x16x16xf32>
    %75 = vector.extract_strided_slice %59 {offsets = [2, 0, 0], sizes = [1, 16, 16], strides = [1, 1, 1]} : vector<4x16x16xf32> to vector<1x16x16xf32>
    %c2_74 = arith.constant 2 : index
    %c0_75 = arith.constant 0 : index
    %c0_76 = arith.constant 0 : index
    %c0_77 = arith.constant 0 : index
    %76 = vector.load %arg3[%c2_74, %c0_75, %c0_76, %c0_77] : memref<4x8x1x1xf32, #tpu.memory_space<vmem>>, vector<1x8x1x1xf32>
    %77 = vector.shape_cast %76 : vector<1x8x1x1xf32> to vector<8x1x1xf32>
    %78 = vector.broadcast %75 : vector<1x16x16xf32> to vector<8x16x16xf32>
    %79 = vector.broadcast %77 : vector<8x1x1xf32> to vector<8x16x16xf32>
    %80 = arith.mulf %78, %79 : vector<8x16x16xf32>
    %81 = arith.addf %74, %80 : vector<8x16x16xf32>
    %82 = vector.extract_strided_slice %59 {offsets = [3, 0, 0], sizes = [1, 16, 16], strides = [1, 1, 1]} : vector<4x16x16xf32> to vector<1x16x16xf32>
    %c3_78 = arith.constant 3 : index
    %c0_79 = arith.constant 0 : index
    %c0_80 = arith.constant 0 : index
    %c0_81 = arith.constant 0 : index
    %83 = vector.load %arg3[%c3_78, %c0_79, %c0_80, %c0_81] : memref<4x8x1x1xf32, #tpu.memory_space<vmem>>, vector<1x8x1x1xf32>
    %84 = vector.shape_cast %83 : vector<1x8x1x1xf32> to vector<8x1x1xf32>
    %85 = vector.broadcast %82 : vector<1x16x16xf32> to vector<8x16x16xf32>
    %86 = vector.broadcast %84 : vector<8x1x1xf32> to vector<8x16x16xf32>
    %87 = arith.mulf %85, %86 : vector<8x16x16xf32>
    %88 = arith.addf %81, %87 : vector<8x16x16xf32>
    %c0_82 = arith.constant 0 : index
    %c0_83 = arith.constant 0 : index
    %c0_84 = arith.constant 0 : index
    %89 = vector.load %arg4[%c0_82, %c0_83, %c0_84] : memref<8x1x1xf32, #tpu.memory_space<vmem>>, vector<8x1x1xf32>
    %90 = vector.broadcast %89 : vector<8x1x1xf32> to vector<8x16x16xf32>
    %91 = arith.addf %88, %90 : vector<8x16x16xf32>
    %cst_85 = arith.constant 0.000000e+00 : f32
    %92 = vector.broadcast %cst_85 : f32 to vector<8x16x16xf32>
    %93 = arith.maximumf %91, %92 : vector<8x16x16xf32>
    %c0_86 = arith.constant 0 : index
    %c0_87 = arith.constant 0 : index
    %c0_88 = arith.constant 0 : index
    %c0_89 = arith.constant 0 : index
    %94 = vector.load %arg5[%c0_86, %c0_87, %c0_88, %c0_89] : memref<1x8x16x16xf32, #tpu.memory_space<vmem>>, vector<1x8x16x16xf32>
    %95 = vector.shape_cast %94 : vector<1x8x16x16xf32> to vector<8x16x16xf32>
    %96 = vector.shape_cast %93 : vector<8x16x16xf32> to vector<1x8x16x16xf32>
    tpu.vector_store %arg5[%c0_86, %c0_87, %c0_88, %c0_89], %96 {strides = array<i32>} : memref<1x8x16x16xf32, #tpu.memory_space<vmem>>, vector<1x8x16x16xf32>,
    return
  }
  func.func @transform_0(%arg0: i32) -> (i32, i32, i32, i32) {
    %c0_i32 = arith.constant 0 : i32
    %c0_i32_0 = arith.constant 0 : i32
    %c0_i32_1 = arith.constant 0 : i32
    %c0_i32_2 = arith.constant 0 : i32
    return %arg0, %c0_i32, %c0_i32_0, %c0_i32_1 : i32, i32, i32, i32
  }
  func.func @transform_1(%arg0: i32) -> (i32, i32, i32, i32) {
    %c0_i32 = arith.constant 0 : i32
    %c0_i32_0 = arith.constant 0 : i32
    %c0_i32_1 = arith.constant 0 : i32
    %c0_i32_2 = arith.constant 0 : i32
    %c0_i32_3 = arith.constant 0 : i32
    return %c0_i32, %c0_i32_0, %c0_i32_1, %c0_i32_2 : i32, i32, i32, i32
  }
  func.func @transform_2(%arg0: i32) -> (i32, i32, i32, i32) {
    %c0_i32 = arith.constant 0 : i32
    %c0_i32_0 = arith.constant 0 : i32
    %c0_i32_1 = arith.constant 0 : i32
    %c0_i32_2 = arith.constant 0 : i32
    %c0_i32_3 = arith.constant 0 : i32
    return %c0_i32, %c0_i32_0, %c0_i32_1, %c0_i32_2 : i32, i32, i32, i32
  }
  func.func @transform_3(%arg0: i32) -> (i32, i32, i32) {
    %c0_i32 = arith.constant 0 : i32
    %c0_i32_0 = arith.constant 0 : i32
    %c0_i32_1 = arith.constant 0 : i32
    %c0_i32_2 = arith.constant 0 : i32
    return %c0_i32, %c0_i32_0, %c0_i32_1 : i32, i32, i32
  }
  func.func @transform_4(%arg0: i32) -> (i32, i32, i32, i32) {
    %c0_i32 = arith.constant 0 : i32
    %c0_i32_0 = arith.constant 0 : i32
    %c0_i32_1 = arith.constant 0 : i32
    %c0_i32_2 = arith.constant 0 : i32
    return %arg0, %c0_i32, %c0_i32_0, %c0_i32_1 : i32, i32, i32, i32
  }
}

</mosaic_0001>

<bundles_post_ra>
// kernel: tpu_custom_call.1
= control target key start
LH: loop header
LB: loop body
LE: loop exit
PB: predicated region body
PF: predicated region fallthrough
CT: control target
= control target key end

     0   :  { %9 = vsyncpa [#allocation4], 0  ;;  %s2733_s0 = inlined_call_operand.hbm [shape: f32[2,4,16,16], index: 0, kind: input, shape index: {}]   ;;  %s2734_s1 = inlined_call_operand.vmem [shape: f32[9,4,1,1], index: 1, kind: input, shape index: {}]   ;;  %s2735_s2 = inlined_call_operand.vmem [shape: f32[4,8,1,1], index: 2, kind: input, shape index: {}]   ;;  %s2736_s3 = inlined_call_operand.vmem [shape: f32[8,1,1], index: 3, kind: input, shape index: {}]   ;;  %s2737_s4 = inlined_call_operand.hbm [shape: f32[2,8,16,16], index: 4, kind: output, shape index: {}]  }
   0x1   :  { %11 = vsyncpa [#allocation4 + $0x1], 0 }
   0x2   :  { %12 = vsyncpa [#allocation5], 0 }
   0x3   :  { %14 = vsyncpa [#allocation5 + $0x1], 0  ;;  %s2009_s15 = smov 0   ;;  %s2011_s16 = smov 0  }
   0x4   :  { %s2013_s17 = smov 0   ;;  %s2015_s18 = smov 0  }
   0x5 LB: > { %s2030_s19 = sadd.s32 4294967295, %s1971_s18   ;;  %s1674_s20 = sadd.s32 4294967294, %s1971_s18   ;;  %s1971_s18 = sphi %s2015_s18, %s2752_s18   ;;  %s1967_s17 = sphi %s2013_s17, %s2751_s17   ;;  %s1963_s16 = sphi %s2011_s16, %s2750_s16   ;;  %s1959_s15 = sphi %s2009_s15, %s2749_s15  }
   0x6   : > { %s2034_s21 = sadd.s32 1, %s1971_s18   ;;  %s27_s22 = sadd.s32 1, %s1967_s17 }
   0x7   : > { %s24_s23 = ssub.s32 %s1971_s18, %s2034_s21  ;;  %p34_p0 = scmp.ne.s32.totalorder %s1967_s17, %s1963_s16 }
   0x8   : > { %p25_p1 = scmp.eq.s32.totalorder %s24_s23, 0  ;;  %p35_p2 = scmp.eq.s32.totalorder %s1971_s18, 0 }
   0x9   : > { %p40_p3 = scmp.ne.s32.totalorder %s1963_s16, %s1959_s15  ;;  %p41_p4 = scmp.eq.s32.totalorder %s2030_s19, 0 }
   0xa   : > { %s2046_s24 = scalar_select %p25_p1, %s1967_s17, %s27_s22  }
   0xb   : > { %p2048_p5 = por %p35_p2, %p34_p0  ;;  %p2052_p6 = por %p41_p4, %p40_p3 }
   0xc   : > { %p127_p7 = scmp.eq.s32.totalorder %s2030_s19, 1  ;;  %p133_p8 = scmp.eq.s32.totalorder %s1674_s20, 1 }
   0xd   : > { %s2741_s26 = scalar_select %p2052_p6, 1, 0 }
   0xe   : > { %p1834_p10 = scmp.lt.s32.totalorder %s1971_s18, 2  ;;  %p2059_p11 = por %p127_p7, %p34_p0 }
   0xf   : > { %p2063_p12 = por %p133_p8, %p40_p3  ;;  %s162_s29 = sand.u32 1, %s1967_s17  }
  0x10   : > { %s2742_s27 = scalar_select %p2059_p11, 1, 0 }
  0x11   : > { %s2743_s28 = scalar_select %p2063_p12, 1, 0 }
  0x12   : > { %s1820_s30 = sshll.u32 %s1971_s18, 10  ;;  %s1677_s5 = sshll.u32 %s162_s29, 6 }
  0x13   : > { %s2072_s8 = scalar_lea.hbm %s2733_s0, %s1820_s30  ;;  %s166_s9 = scalar_lea.vmem [#allocation3], %s1677_s5 }
  0x14   : > { %s173_s10 = sshll.u32 %s166_s9, 4  ;;  %p2076_p13 = pnand %p1834_p10, %p2048_p5  ;;  %s2080_s10 = int_to_ptr.vmem [resolvable:$true] %s173_s10 }
  0x15   : > { %s2082_s12 = scalar_lea.sflag [#allocation4], %s162_s29  ;;  %s1879_s13 = scalar_lea.hbm %s2072_s8, 1024 }
  0x16   : > { %p1880_p0 = scmp.ne.s32.totalorder %s2072_s8, %s1879_s13  ;;  %p1881_p1 = pneg %p2076_p13 }
  0x17   : > { %s1884_s22 = scalar_lea.hbm %s2733_s0, 2048  ;;  %p1885_p4 = scmp.lt.s32.totalorder %s2072_s8, %s2733_s0 }
  0x18   : > { %p1882_p2 = pnand %p1881_p1, %p1880_p0  ;;  %p1886_p5 = scmp.lt.s32.totalorder %s1884_s22, %s1879_s13 }
  0x1a   : > { %p1883_p3 = pneg %p1882_p2  ;;  %p1887_p7 = por %p1886_p5, %p1885_p4 }
  0x1c   : > { %p1888_p8 = pnand %p1887_p7, %p1883_p3 }
  0x1e   : > { %1891 = shalt.err (!%p1888_p8)
}
  0x1f   : > { %s1892_s29 = scalar_lea.vmem %s2080_s10, 1024  ;;  %s1973_s30 = smov [#allocation3]  }
  0x20   : > { %p1893_p10 = scmp.ne.s32.totalorder %s2080_s10, %s1892_s29  ;;  %s1897_s5 = sshll.u32 %s1973_s30, 4  ;;  %s1898_s5 = int_to_ptr.vmem [resolvable:$false] %s1897_s5 }
  0x21   : > { %s1899_s6 = scalar_lea.vmem %s1898_s5, 2048  ;;  %p1900_p2 = scmp.lt.s32.totalorder %s2080_s10, %s1898_s5 }
  0x22   : > { %p1895_p9 = pnand %p1893_p10, %p1881_p1  ;;  %p1901_p12 = scmp.lt.s32.totalorder %s1899_s6, %s1892_s29 }
  0x24   : > { %p1896_p0 = pneg %p1895_p9  ;;  %p1902_p11 = por %p1901_p12, %p1900_p2 }
  0x26   : > { %p1903_p6 = pnand %p1902_p11, %p1896_p0 }
  0x28   : > { %1906 = shalt.err (!%p1903_p6)
}
  0x29   : > { %s1974_s7 = smov 128   ;;  %s1975_s9 = smov 8  }
  0x2a   : > { %1829 = dma.hbm_to_vmem [thread:$0]  (!%p2076_p13), %s2072_s8, 1024, %s2080_s10, %s2082_s12, %s1974_s7, %s1974_s7, %s1975_s9  }
  0x2b   : > { %p1680_p9 = scmp.ge.s32.totalorder %s1971_s18, 1  ;;  %p181_p1 = scmp.lt.s32.totalorder %s1971_s18, 3 }
  0x2d   : > { %p182_p3 = pnand %p1680_p9, %p181_p1 }
  0x2e   : > { %s2106_s13 = sand.u32 (!%p182_p3), 1, %s1963_s16   ;;  %p2745_p6 = scmp.ne.s32.totalorder (!%p182_p3), %s2741_s26, 0 }
  0x2f   : > { %185 = sbr.rel (%p182_p3) target bundleno = 772 (0x304), region = 36  ;;  %s1681_s14 = sshll.u32 (!%p182_p3), %s2106_s13, 6 }
  0x30   : > { %s188_s20 = scalar_lea.sflag (!%p182_p3), [#allocation4], %s2106_s13  ;;  %s2110_s22 = scalar_lea.vmem (!%p182_p3), [#allocation3], %s1681_s14 }
  0x34   : > { %1950 = dma.done.wait (%p2745_p6), %s188_s20, 1024  }
  0x35   : > { %1952 = vsyncadd (%p2745_p6), %s188_s20, 4294966272  ;;  %vm216_vm0 = vcmask 146432   ;;  %v1976_v0 = vmov 0   ;;  %v1977_v1 = vmov 0.0   ;;  %vm219_vm1 = vcmask 140288   ;;  %v232_v2 = vld [vmem:[%s2110_s22 + $0x10] sm:$0xff] }
  0x36   : > { %1878 = vset.pattern.permute.xlu1 %v1976_v0  ;;  %1877 = vset.pattern.permute.xlu0 %v1976_v0  ;;  %221 = vst.msk [vmem:[#allocation2 + $0x18] sm:$0xff] %vm216_vm0, %v1977_v1  ;;  %222 = vst.msk [vmem:[#allocation2 + $0x20] sm:$0xff] %vm216_vm0, %v1977_v1  ;;  %v230_v3 = vld [vmem:[%s2110_s22] sm:$0xff]  ;;  %s1978_s26 = smov 1   ;;  %v233_v4 = vld [vmem:[%s2110_s22 + $0x18] sm:$0xff]  ;;  %vm270_vm2 = vcmask 138248  }
  0x37   : > { %217 = vst.msk [vmem:[#allocation2] sm:$0xff] %vm216_vm0, %v1977_v1  ;;  %218 = vst.msk [vmem:[#allocation2 + $0x8] sm:$0xff] %vm216_vm0, %v1977_v1  ;;  %250 = vrot.lane.b32.xlu1 %v232_v2, %s1978_s26  ;;  %246 = vrot.lane.b32.xlu0 %v230_v3, %s1978_s26  ;;  %v231_v5 = vld [vmem:[%s2110_s22 + $0x8] sm:$0xff]  ;;  %v234_v7 = vld [vmem:[%s2110_s22 + $0x20] sm:$0xff]  ;;  %s1979_s29 = smov 127   ;;  %s1980_s30 = smov 126  }
  0x38   : > { %224 = vst.msk [vmem:[#allocation2 + $0x30] sm:$0xff] %vm216_vm0, %v1977_v1  ;;  %225 = vst.msk [vmem:[#allocation2 + $0x38] sm:$0xff] %vm216_vm0, %v1977_v1  ;;  %v235_v6 = vld [vmem:[%s2110_s22 + $0x28] sm:$0xff]  ;;  %v237_v8 = vld [vmem:[%s2110_s22 + $0x38] sm:$0xff]  ;;  %vm1570_vm3 = vcmask 130048   ;;  %s1821_s20 = sshll.u32 %s2030_s19, 11 }
  0x39   : > { %227 = vst.msk [vmem:[#allocation2 + $0x48] sm:$0xff] %vm216_vm0, %v1977_v1  ;;  %228 = vst.msk [vmem:[#allocation2 + $0x50] sm:$0xff] %vm216_vm0, %v1977_v1  ;;  %v236_v9 = vld [vmem:[%s2110_s22 + $0x30] sm:$0xff]  ;;  %v1684_v10 = vld [vmem:[%s2734_s1 + $0x1] ss:$0 sm:$0xff]  ;;  %s2680_s8 = scalar_lea.hbm %s2737_s4, %s1821_s20  ;;  %s1588_s10 = scalar_lea.sflag [#allocation5], %s2106_s13 }
  0x3a   : > { %223 = vst.msk [vmem:[#allocation2 + $0x28] sm:$0x3] %vm219_vm1, %v1977_v1  ;;  %220 = vst.msk [vmem:[#allocation2 + $0x10] sm:$0x3] %vm219_vm1, %v1977_v1  ;;  %v1683_v11 = vld [vmem:[%s2734_s1] ss:$0 sm:$0xff] }
  0x3b   : > { %226 = vst.msk [vmem:[#allocation2 + $0x40] sm:$0x3] %vm219_vm1, %v1977_v1  ;;  %229 = vst.msk [vmem:[#allocation2 + $0x58] sm:$0x3] %vm219_vm1, %v1977_v1  ;;  %252 = vrot.lane.b32.xlu1 %v233_v4, %s1978_s26  ;;  %248 = vrot.lane.b32.xlu0 %v231_v5, %s1978_s26  ;;  %v1685_v12 = vld [vmem:[%s2734_s1 + $0x2] ss:$0 sm:$0xff] }
  0x3c   : > { %v1686_v13 = vld [vmem:[%s2734_s1 + $0x3] ss:$0 sm:$0xff]  ;;  %v1691_v14 = vld [vmem:[%s2734_s1 + $0x4] ss:$0 sm:$0xff]  ;;  %v1692_v15 = vld [vmem:[%s2734_s1 + $0x5] ss:$0 sm:$0xff] }
  0x3d   : > { %v1693_v16 = vld [vmem:[%s2734_s1 + $0x6] ss:$0 sm:$0xff]  ;;  %v1694_v17 = vld [vmem:[%s2734_s1 + $0x7] ss:$0 sm:$0xff]  ;;  %v1699_v18 = vld [vmem:[%s2734_s1 + $0x8] ss:$0 sm:$0xff] }
  0x3e   : > { %v1700_v19 = vld [vmem:[%s2734_s1 + $0x9] ss:$0 sm:$0xff]  ;;  %v1701_v20 = vld [vmem:[%s2734_s1 + $0xa] ss:$0 sm:$0xff]  ;;  %v1702_v21 = vld [vmem:[%s2734_s1 + $0xb] ss:$0 sm:$0xff] }
  0x3f   : > { %256 = vrot.lane.b32.xlu1 %v235_v6, %s1978_s26  ;;  %254 = vrot.lane.b32.xlu0 %v234_v7, %s1978_s26  ;;  %v1707_v22 = vld [vmem:[%s2734_s1 + $0xc] ss:$0 sm:$0xff]  ;;  %v1708_v23 = vld [vmem:[%s2734_s1 + $0xd] ss:$0 sm:$0xff]  ;;  %p2746_p12 = scmp.ne.s32.totalorder %s2742_s27, 0 }
  0x40   : > { %v1709_v24 = vld [vmem:[%s2734_s1 + $0xe] ss:$0 sm:$0xff]  ;;  %v1710_v25 = vld [vmem:[%s2734_s1 + $0xf] ss:$0 sm:$0xff]  ;;  %v1715_v26 = vld [vmem:[%s2734_s1 + $0x10] ss:$0 sm:$0xff] }
  0x41   : > { %v1716_v27 = vld [vmem:[%s2734_s1 + $0x11] ss:$0 sm:$0xff]  ;;  %v1717_v28 = vld [vmem:[%s2734_s1 + $0x12] ss:$0 sm:$0xff]  ;;  %v1718_v29 = vld [vmem:[%s2734_s1 + $0x13] ss:$0 sm:$0xff] }
  0x42   : > { %v1723_v30 = vld [vmem:[%s2734_s1 + $0x14] ss:$0 sm:$0xff]  ;;  %v1724_v31 = vld [vmem:[%s2734_s1 + $0x15] ss:$0 sm:$0xff]  ;;  %v1725_v32 = vld [vmem:[%s2734_s1 + $0x16] ss:$0 sm:$0xff] }
  0x43   : > { %260 = vrot.lane.b32.xlu1 %v237_v8, %s1978_s26  ;;  %258 = vrot.lane.b32.xlu0 %v236_v9, %s1978_s26  ;;  %v1726_v33 = vld [vmem:[%s2734_s1 + $0x17] ss:$0 sm:$0xff]  ;;  %v1731_v34 = vld [vmem:[%s2734_s1 + $0x18] ss:$0 sm:$0xff] }
  0x44   : > { %v1732_v35 = vld [vmem:[%s2734_s1 + $0x19] ss:$0 sm:$0xff]  ;;  %v1733_v36 = vld [vmem:[%s2734_s1 + $0x1a] ss:$0 sm:$0xff] }
  0x47   : > { %316 = vperm.xlu1 %1878, %v1684_v10   ;;  %312 = vperm.xlu0 %1877, %v1683_v11  }
  0x4b   : > { %320 = vperm.xlu1 %1878, %v1685_v12   ;;  %324 = vperm.xlu0 %1877, %v1686_v13  }
  0x4f   : > { %369 = vperm.xlu1 %1878, %v1691_v14   ;;  %373 = vperm.xlu0 %1877, %v1692_v15  }
  0x53   : > { %377 = vperm.xlu1 %1878, %v1693_v16   ;;  %381 = vperm.xlu0 %1877, %v1694_v17  }
  0x57   : > { %458 = vperm.xlu1 %1878, %v1699_v18   ;;  %462 = vperm.xlu0 %1877, %v1700_v19  }
  0x5b   : > { %466 = vperm.xlu1 %1878, %v1701_v20   ;;  %470 = vperm.xlu0 %1877, %v1702_v21  }
  0x5f   : > { %555 = vperm.xlu1 %1878, %v1707_v22   ;;  %559 = vperm.xlu0 %1877, %v1708_v23  }
  0x63   : > { %563 = vperm.xlu1 %1878, %v1709_v24   ;;  %567 = vperm.xlu0 %1877, %v1710_v25  }
  0x67   : > { %612 = vperm.xlu1 %1878, %v1715_v26   ;;  %616 = vperm.xlu0 %1877, %v1716_v27  }
  0x6b   : > { %620 = vperm.xlu1 %1878, %v1717_v28   ;;  %624 = vperm.xlu0 %1877, %v1718_v29  }
  0x6f   : > { %701 = vperm.xlu1 %1878, %v1723_v30   ;;  %705 = vperm.xlu0 %1877, %v1724_v31  }
  0x73   : > { %709 = vperm.xlu1 %1878, %v1725_v32   ;;  %713 = vperm.xlu0 %1877, %v1726_v33  }
  0x77   : > { %798 = vperm.xlu1 %1878, %v1731_v34   ;;  %802 = vperm.xlu0 %1877, %v1732_v35  }
  0x7b   : > { %806 = vperm.xlu1 %1878, %v1733_v36  }
  0xa9   : > { %v251_v37 = vpop.permute.xlu1 %250  ;;  %v247_v38 = vpop.permute.xlu0 %246 }
  0xaa   : > { %273 = vst.msk [vmem:[#allocation2 + $0x19] sm:$0xff] %vm270_vm2, %v251_v37  ;;  %271 = vst.msk [vmem:[#allocation2 + $0x1] sm:$0xff] %vm270_vm2, %v247_v38 }
  0xad   : > { %v253_v39 = vpop.permute.xlu1 %252  ;;  %v249_v40 = vpop.permute.xlu0 %248 }
  0xae   : > { %274 = vst.msk [vmem:[#allocation2 + $0x21] sm:$0xff] %vm270_vm2, %v253_v39  ;;  %272 = vst.msk [vmem:[#allocation2 + $0x9] sm:$0xff] %vm270_vm2, %v249_v40 }
  0xb1   : > { %v257_v41 = vpop.permute.xlu1 %256  ;;  %v255_v42 = vpop.permute.xlu0 %254  ;;  %v2221_v50 = vld [vmem:[#allocation2] sm:$0xff]  ;;  %v2229_v55 = vld [vmem:[#allocation2 + $0x18] sm:$0xff] }
  0xb2   : > { %276 = vst.msk [vmem:[#allocation2 + $0x39] sm:$0xff] %vm270_vm2, %v257_v41  ;;  %275 = vst.msk [vmem:[#allocation2 + $0x31] sm:$0xff] %vm270_vm2, %v255_v42  ;;  %v2277_v22 = vld [vmem:[#allocation2 + $0x1] sm:$0xff]  ;;  %v2285_v27 = vld [vmem:[#allocation2 + $0x19] sm:$0xff] }
  0xb5   : > { %v261_v43 = vpop.permute.xlu1 %260  ;;  %v259_v44 = vpop.permute.xlu0 %258  ;;  %v2223_v51 = vld [vmem:[#allocation2 + $0x8] sm:$0xff]  ;;  %v2231_v56 = vld [vmem:[#allocation2 + $0x20] sm:$0xff] }
  0xb6   : > { %278 = vst.msk [vmem:[#allocation2 + $0x51] sm:$0xff] %vm270_vm2, %v261_v43  ;;  %277 = vst.msk [vmem:[#allocation2 + $0x49] sm:$0xff] %vm270_vm2, %v259_v44  ;;  %v2279_v23 = vld [vmem:[#allocation2 + $0x9] sm:$0xff]  ;;  %v2287_v28 = vld [vmem:[#allocation2 + $0x21] sm:$0xff] }
  0xb9   : > { %v2237_v61 = vld [vmem:[#allocation2 + $0x30] sm:$0xff]  ;;  %v2239_v62 = vld [vmem:[#allocation2 + $0x38] sm:$0xff] }
  0xba   : > { %v2293_v32 = vld [vmem:[#allocation2 + $0x31] sm:$0xff]  ;;  %v2295_v33 = vld [vmem:[#allocation2 + $0x39] sm:$0xff] }
  0xbd   : > { %v2245_v3 = vld [vmem:[#allocation2 + $0x48] sm:$0xff]  ;;  %v2247_v4 = vld [vmem:[#allocation2 + $0x50] sm:$0xff] }
  0xbe   : > { %v2301_v37 = vld [vmem:[#allocation2 + $0x49] sm:$0xff]  ;;  %v2303_v38 = vld [vmem:[#allocation2 + $0x51] sm:$0xff] }
  0xc2   : > { %v2213_v45 = vpop.permute.xlu1 %316  ;;  %v2215_v46 = vpop.permute.xlu0 %312 }
  0xc6   : > { %v2217_v47 = vpop.permute.xlu1 %320  ;;  %v2219_v48 = vpop.permute.xlu0 %324 }
  0xca   : > { %v370_v49 = vpop.permute.xlu1 %369  ;;  %v374_v52 = vpop.permute.xlu0 %373 }
  0xcb   : > { %v384_v53 = vmul.f32 %v370_v49, %v2221_v50  ;;  %v385_v54 = vmul.f32 %v370_v49, %v2223_v51  ;;  %v386_v59 = vmul.f32 %v374_v52, %v2229_v55  ;;  %v387_v60 = vmul.f32 %v374_v52, %v2231_v56 }
  0xcd   : > { %402 = vrot.lane.b32.xlu0 %v385_v54, %s1979_s29  ;;  %400 = vrot.lane.b32.xlu1 %v384_v53, %s1979_s29 }
  0xce   : > { %v378_v57 = vpop.permute.xlu1 %377  ;;  %v382_v58 = vpop.permute.xlu0 %381 }
  0xcf   : > { %v388_v0 = vmul.f32 %v378_v57, %v2237_v61  ;;  %v389_v1 = vmul.f32 %v378_v57, %v2239_v62  ;;  %v390_v6 = vmul.f32 %v382_v58, %v2245_v3  ;;  %v391_v7 = vmul.f32 %v382_v58, %v2247_v4 }
  0xd1   : > { %406 = vrot.lane.b32.xlu0 %v387_v60, %s1979_s29  ;;  %404 = vrot.lane.b32.xlu1 %v386_v59, %s1979_s29 }
  0xd2   : > { %v459_v63 = vpop.permute.xlu1 %458  ;;  %v463_v2 = vpop.permute.xlu0 %462 }
  0xd3   : > { %v473_v9 = vmul.f32 %v459_v63, %v2221_v50  ;;  %v474_v10 = vmul.f32 %v459_v63, %v2223_v51  ;;  %v475_v12 = vmul.f32 %v463_v2, %v2229_v55  ;;  %v476_v13 = vmul.f32 %v463_v2, %v2231_v56  ;;  %v1734_v63 = vld [vmem:[%s2734_s1 + $0x1b] ss:$0 sm:$0xff]  ;;  %v1741_v2 = vld [vmem:[%s2734_s1 + $0x1e] ss:$0 sm:$0xff] }
  0xd5   : > { %410 = vrot.lane.b32.xlu0 %v389_v1, %s1979_s29  ;;  %408 = vrot.lane.b32.xlu1 %v388_v0, %s1979_s29  ;;  %v1739_v0 = vld [vmem:[%s2734_s1 + $0x1c] ss:$0 sm:$0xff]  ;;  %v1740_v1 = vld [vmem:[%s2734_s1 + $0x1d] ss:$0 sm:$0xff] }
  0xd6   : > { %v467_v5 = vpop.permute.xlu1 %466  ;;  %v471_v8 = vpop.permute.xlu0 %470 }
  0xd7   : > { %v477_v16 = vmul.f32 %v467_v5, %v2237_v61  ;;  %v478_v17 = vmul.f32 %v467_v5, %v2239_v62  ;;  %v479_v19 = vmul.f32 %v471_v8, %v2245_v3  ;;  %v480_v20 = vmul.f32 %v471_v8, %v2247_v4  ;;  %v1742_v5 = vld [vmem:[%s2734_s1 + $0x1f] ss:$0 sm:$0xff] }
  0xd9   : > { %414 = vrot.lane.b32.xlu0 %v391_v7, %s1979_s29  ;;  %412 = vrot.lane.b32.xlu1 %v390_v6, %s1979_s29 }
  0xda   : > { %v2255_v11 = vpop.permute.xlu1 %555  ;;  %v2261_v14 = vpop.permute.xlu0 %559 }
  0xdd   : > { %491 = vrot.lane.b32.xlu0 %v474_v10, %s1980_s30  ;;  %489 = vrot.lane.b32.xlu1 %v473_v9, %s1980_s30  ;;  %v328_v9 = vmul.f32 %v2215_v46, %v2223_v51  ;;  %v327_v10 = vmul.f32 %v2215_v46, %v2221_v50  ;;  %v332_v51 = vmul.f32 %v2217_v47, %v2239_v62 }
  0xde   : > { %v2265_v15 = vpop.permute.xlu1 %563  ;;  %v2271_v18 = vpop.permute.xlu0 %567  ;;  %v331_v46 = vmul.f32 %v2217_v47, %v2237_v61  ;;  %v570_v62 = vmul.f32 %v2255_v11, %v2277_v22  ;;  %v571_v47 = vmul.f32 %v2255_v11, %v2279_v23 }
  0xdf   : > { %v574_v11 = vmul.f32 %v2265_v15, %v2293_v32 }
  0xe1   : > { %495 = vrot.lane.b32.xlu0 %v476_v13, %s1980_s30  ;;  %493 = vrot.lane.b32.xlu1 %v475_v12, %s1980_s30 }
  0xe2   : > { %v613_v21 = vpop.permute.xlu1 %612  ;;  %v617_v26 = vpop.permute.xlu0 %616 }
  0xe3   : > { %v627_v24 = vmul.f32 %v613_v21, %v2277_v22  ;;  %v628_v25 = vmul.f32 %v613_v21, %v2279_v23  ;;  %v629_v29 = vmul.f32 %v617_v26, %v2285_v27  ;;  %v630_v30 = vmul.f32 %v617_v26, %v2287_v28 }
  0xe5   : > { %499 = vrot.lane.b32.xlu0 %v478_v17, %s1980_s30  ;;  %497 = vrot.lane.b32.xlu1 %v477_v16, %s1980_s30 }
  0xe6   : > { %v621_v31 = vpop.permute.xlu1 %620  ;;  %v625_v36 = vpop.permute.xlu0 %624 }
  0xe7   : > { %v631_v34 = vmul.f32 %v621_v31, %v2293_v32  ;;  %v632_v35 = vmul.f32 %v621_v31, %v2295_v33  ;;  %v633_v39 = vmul.f32 %v625_v36, %v2301_v37  ;;  %v634_v40 = vmul.f32 %v625_v36, %v2303_v38 }
  0xe9   : > { %503 = vrot.lane.b32.xlu0 %v480_v20, %s1980_s30  ;;  %501 = vrot.lane.b32.xlu1 %v479_v19, %s1980_s30  ;;  %v330_v19 = vmul.f32 %v2213_v45, %v2231_v56  ;;  %v329_v20 = vmul.f32 %v2213_v45, %v2229_v55  ;;  %v334_v56 = vmul.f32 %v2219_v48, %v2247_v4 }
  0xea   : > { %v702_v41 = vpop.permute.xlu1 %701  ;;  %v706_v44 = vpop.permute.xlu0 %705  ;;  %v333_v45 = vmul.f32 %v2219_v48, %v2245_v3  ;;  %v572_v48 = vmul.f32 %v2261_v14, %v2285_v27  ;;  %v573_v3 = vmul.f32 %v2261_v14, %v2287_v28  ;;  %v576_v14 = vmul.f32 %v2271_v18, %v2301_v37 }
  0xeb   : > { %v716_v42 = vmul.f32 %v702_v41, %v2277_v22  ;;  %v717_v43 = vmul.f32 %v702_v41, %v2279_v23  ;;  %v718_v49 = vmul.f32 %v706_v44, %v2285_v27  ;;  %v719_v52 = vmul.f32 %v706_v44, %v2287_v28 }
  0xec   : > { %v575_v23 = vmul.f32 %v2265_v15, %v2295_v33  ;;  %v577_v28 = vmul.f32 %v2271_v18, %v2303_v38 }
  0xed   : > { %645 = vrot.lane.b32.xlu0 %v628_v25, %s1979_s29  ;;  %643 = vrot.lane.b32.xlu1 %v627_v24, %s1979_s29 }
  0xee   : > { %v710_v53 = vpop.permute.xlu1 %709  ;;  %v714_v58 = vpop.permute.xlu0 %713 }
  0xef   : > { %v720_v54 = vmul.f32 %v710_v53, %v2293_v32  ;;  %v721_v57 = vmul.f32 %v710_v53, %v2295_v33  ;;  %v722_v59 = vmul.f32 %v714_v58, %v2301_v37  ;;  %v723_v60 = vmul.f32 %v714_v58, %v2303_v38 }
  0xf1   : > { %649 = vrot.lane.b32.xlu0 %v630_v30, %s1979_s29  ;;  %647 = vrot.lane.b32.xlu1 %v629_v29, %s1979_s29 }
  0xf2   : > { %v2340_v6 = vpop.permute.xlu1 %798  ;;  %v2342_v7 = vpop.permute.xlu0 %802 }
  0xf5   : > { %653 = vrot.lane.b32.xlu0 %v632_v35, %s1979_s29  ;;  %651 = vrot.lane.b32.xlu1 %v631_v34, %s1979_s29 }
  0xf6   : > { %v2344_v8 = vpop.permute.xlu1 %806 }
  0xf9   : > { %657 = vrot.lane.b32.xlu0 %v634_v40, %s1979_s29  ;;  %655 = vrot.lane.b32.xlu1 %v633_v39, %s1979_s29 }
  0xfd   : > { %734 = vrot.lane.b32.xlu0 %v717_v43, %s1980_s30  ;;  %732 = vrot.lane.b32.xlu1 %v716_v42, %s1980_s30 }
 0x101   : > { %738 = vrot.lane.b32.xlu0 %v719_v52, %s1980_s30  ;;  %736 = vrot.lane.b32.xlu1 %v718_v49, %s1980_s30 }
 0x105   : > { %742 = vrot.lane.b32.xlu0 %v721_v57, %s1980_s30  ;;  %740 = vrot.lane.b32.xlu1 %v720_v54, %s1980_s30 }
 0x109   : > { %746 = vrot.lane.b32.xlu0 %v723_v60, %s1980_s30  ;;  %744 = vrot.lane.b32.xlu1 %v722_v59, %s1980_s30 }
 0x10d   : > { %810 = vperm.xlu0 %1877, %v1734_v63   ;;  %855 = vperm.xlu1 %1878, %v1739_v0  }
 0x111   : > { %859 = vperm.xlu0 %1877, %v1740_v1   ;;  %863 = vperm.xlu1 %1878, %v1741_v2  }
 0x115   : > { %867 = vperm.xlu0 %1877, %v1742_v5  }
 0x13f   : > { %v403_v12 = vpop.permute.xlu0 %402  ;;  %v401_v13 = vpop.permute.xlu1 %400 }
 0x140   : > { %v425_v16 = vadd.f32 %v403_v12, %v328_v9  ;;  %v424_v17 = vadd.f32 %v401_v13, %v327_v10 }
 0x143   : > { %v407_v21 = vpop.permute.xlu0 %406  ;;  %v405_v24 = vpop.permute.xlu1 %404 }
 0x144   : > { %v427_v25 = vadd.f32 %v407_v21, %v330_v19  ;;  %v426_v26 = vadd.f32 %v405_v24, %v329_v20 }
 0x147   : > { %v411_v50 = vpop.permute.xlu0 %410  ;;  %v409_v29 = vpop.permute.xlu1 %408 }
 0x148   : > { %v429_v30 = vadd.f32 %v411_v50, %v332_v51  ;;  %v428_v31 = vadd.f32 %v409_v29, %v331_v46 }
 0x14b   : > { %v415_v55 = vpop.permute.xlu0 %414  ;;  %v413_v34 = vpop.permute.xlu1 %412 }
 0x14c   : > { %v431_v35 = vadd.f32 %v415_v55, %v334_v56  ;;  %v430_v36 = vadd.f32 %v413_v34, %v333_v45 }
 0x14f   : > { %v492_v39 = vpop.permute.xlu0 %491  ;;  %v490_v40 = vpop.permute.xlu1 %489 }
 0x150   : > { %v514_v61 = vadd.f32 %v492_v39, %v425_v16  ;;  %v513_v41 = vadd.f32 %v490_v40, %v424_v17 }
 0x152   : > { %v579_v42 = vadd.f32 %v571_v47, %v514_v61  ;;  %v578_v43 = vadd.f32 %v570_v62, %v513_v41  ;;  %v2382_v47 = vld [vmem:[#allocation2 + $0x2] sm:$0xff]  ;;  %v2384_v61 = vld [vmem:[#allocation2 + $0xa] sm:$0xff] }
 0x153   : > { %v496_v4 = vpop.permute.xlu0 %495  ;;  %v494_v44 = vpop.permute.xlu1 %493  ;;  %v2386_v41 = vld [vmem:[#allocation2 + $0x4a] sm:$0xff] }
 0x154   : > { %v516_v49 = vadd.f32 %v496_v4, %v427_v25  ;;  %v515_v52 = vadd.f32 %v494_v44, %v426_v26 }
 0x156   : > { %v581_v53 = vadd.f32 %v573_v3, %v516_v49  ;;  %v580_v54 = vadd.f32 %v572_v48, %v515_v52 }
 0x157   : > { %v500_v22 = vpop.permute.xlu0 %499  ;;  %v498_v57 = vpop.permute.xlu1 %497 }
 0x158   : > { %v518_v58 = vadd.f32 %v500_v22, %v429_v30  ;;  %v517_v59 = vadd.f32 %v498_v57, %v428_v31  ;;  %v767_v22 = vld [vmem:[#allocation2 + $0x22] sm:$0xff] }
 0x15a   : > { %v583_v60 = vadd.f32 %v575_v23, %v518_v58  ;;  %v582_v63 = vadd.f32 %v574_v11, %v517_v59  ;;  %v768_v59 = vld [vmem:[#allocation2 + $0x32] sm:$0xff] }
 0x15b   : > { %v504_v27 = vpop.permute.xlu0 %503  ;;  %v502_v0 = vpop.permute.xlu1 %501 }
 0x15c   : > { %v520_v1 = vadd.f32 %v504_v27, %v431_v35  ;;  %v519_v2 = vadd.f32 %v502_v0, %v430_v36 }
 0x15e   : > { %v585_v5 = vadd.f32 %v577_v28, %v520_v1  ;;  %v584_v9 = vadd.f32 %v576_v14, %v519_v2  ;;  %v1748_v1 = vld [vmem:[%s2734_s1 + $0x21] ss:$0 sm:$0xff]  ;;  %v1747_v2 = vld [vmem:[%s2734_s1 + $0x20] ss:$0 sm:$0xff] }
 0x15f   : > { %v646_v32 = vpop.permute.xlu0 %645  ;;  %v644_v10 = vpop.permute.xlu1 %643 }
 0x160   : > { %v668_v12 = vadd.f32 %v646_v32, %v579_v42  ;;  %v667_v15 = vadd.f32 %v644_v10, %v578_v43  ;;  %v2388_v42 = vld [vmem:[#allocation2 + $0x52] sm:$0xff]  ;;  %v813_v32 = vmul.f32 %v2340_v6, %v2382_v47  ;;  %v814_v10 = vmul.f32 %v2340_v6, %v2384_v61 }
 0x163   : > { %v650_v33 = vpop.permute.xlu0 %649  ;;  %v648_v13 = vpop.permute.xlu1 %647 }
 0x164   : > { %v670_v16 = vadd.f32 %v650_v33, %v581_v53  ;;  %v669_v17 = vadd.f32 %v648_v13, %v580_v54  ;;  %v766_v54 = vld [vmem:[#allocation2 + $0x1a] sm:$0xff] }
 0x167   : > { %v654_v19 = vpop.permute.xlu0 %653  ;;  %v652_v20 = vpop.permute.xlu1 %651 }
 0x168   : > { %v672_v21 = vadd.f32 %v654_v19, %v583_v60  ;;  %v671_v24 = vadd.f32 %v652_v20, %v582_v63  ;;  %v769_v60 = vld [vmem:[#allocation2 + $0x3a] sm:$0xff] }
 0x169   : > { %v818_v6 = vmul.f32 %v2344_v8, %v769_v60 }
 0x16b   : > { %v658_v37 = vpop.permute.xlu0 %657  ;;  %v656_v25 = vpop.permute.xlu1 %655 }
 0x16c   : > { %v674_v26 = vadd.f32 %v658_v37, %v585_v5  ;;  %v673_v18 = vadd.f32 %v656_v25, %v584_v9  ;;  %v1750_v5 = vld [vmem:[%s2734_s1 + $0x23] ss:$0 sm:$0xff]  ;;  %v1749_v9 = vld [vmem:[%s2734_s1 + $0x22] ss:$0 sm:$0xff] }
 0x16f   : > { %v735_v38 = vpop.permute.xlu0 %734  ;;  %v733_v51 = vpop.permute.xlu1 %732 }
 0x170   : > { %v757_v46 = vadd.f32 %v735_v38, %v668_v12  ;;  %v756_v50 = vadd.f32 %v733_v51, %v667_v15 }
 0x172   : > { %v822_v12 = vadd.f32 %v814_v10, %v757_v46  ;;  %v821_v15 = vadd.f32 %v813_v32, %v756_v50  ;;  %v1800_v32 = vld [vmem:[%s2735_s2 + $0x19] ss:$0 sm:$0xff]  ;;  %v1799_v10 = vld [vmem:[%s2735_s2 + $0x18] ss:$0 sm:$0xff] }
 0x173   : > { %v739_v29 = vpop.permute.xlu0 %738  ;;  %v737_v30 = vpop.permute.xlu1 %736 }
 0x174   : > { %v759_v31 = vadd.f32 %v739_v29, %v670_v16  ;;  %v758_v56 = vadd.f32 %v737_v30, %v669_v17  ;;  %v815_v16 = vmul.f32 %v2342_v7, %v766_v54  ;;  %v816_v17 = vmul.f32 %v2342_v7, %v767_v22 }
 0x177   : > { %v743_v45 = vpop.permute.xlu0 %742  ;;  %v741_v55 = vpop.permute.xlu1 %740 }
 0x178   : > { %v2378_v34 = vadd.f32 %v743_v45, %v672_v21  ;;  %v2380_v35 = vadd.f32 %v741_v55, %v671_v24  ;;  %v824_v21 = vadd.f32 %v816_v17, %v759_v31  ;;  %v823_v24 = vadd.f32 %v815_v16, %v758_v56  ;;  %v1806_v16 = vld [vmem:[%s2735_s2 + $0x1f] ss:$0 sm:$0xff]  ;;  %v1805_v17 = vld [vmem:[%s2735_s2 + $0x1e] ss:$0 sm:$0xff] }
 0x17a   : > { %v826_v51 = vadd.f32 %v818_v6, %v2378_v34  ;;  %v1811_v6 = vld [vmem:[%s2736_s3 + $0x4] ss:$0 sm:$0xff] }
 0x17b   : > { %v747_v36 = vpop.permute.xlu0 %746  ;;  %v745_v39 = vpop.permute.xlu1 %744 }
 0x17c   : > { %v763_v40 = vadd.f32 %v747_v36, %v674_v26  ;;  %v762_v62 = vadd.f32 %v745_v39, %v673_v18  ;;  %v817_v26 = vmul.f32 %v2344_v8, %v768_v59 }
 0x17e   : > { %v825_v7 = vadd.f32 %v817_v26, %v2380_v35  ;;  %v1812_v26 = vld [vmem:[%s2736_s3 + $0x5] ss:$0 sm:$0xff] }
 0x188   : > { %v811_v43 = vpop.permute.xlu0 %810  ;;  %v856_v4 = vpop.permute.xlu1 %855 }
 0x189   : > { %v819_v44 = vmul.f32 %v811_v43, %v2386_v41  ;;  %v820_v48 = vmul.f32 %v811_v43, %v2388_v42  ;;  %v870_v3 = vmul.f32 %v856_v4, %v2382_v47  ;;  %v871_v49 = vmul.f32 %v856_v4, %v2384_v61 }
 0x18b   : > { %888 = vrot.lane.b32.xlu0 %v871_v49, %s1979_s29  ;;  %886 = vrot.lane.b32.xlu1 %v870_v3, %s1979_s29  ;;  %v828_v52 = vadd.f32 %v820_v48, %v763_v40  ;;  %v827_v53 = vadd.f32 %v819_v44, %v762_v62  ;;  %v1752_v48 = vld [vmem:[%s2735_s2 + $0x1] ss:$0 sm:$0xff]  ;;  %v1751_v3 = vld [vmem:[%s2735_s2] ss:$0 sm:$0xff] }
 0x18c   : > { %v860_v57 = vpop.permute.xlu0 %859  ;;  %v864_v58 = vpop.permute.xlu1 %863  ;;  %v1756_v49 = vld [vmem:[%s2735_s2 + $0x5] ss:$0 sm:$0xff] }
 0x18d   : > { %v872_v11 = vmul.f32 %v860_v57, %v766_v54  ;;  %v873_v23 = vmul.f32 %v860_v57, %v767_v22  ;;  %v874_v63 = vmul.f32 %v864_v58, %v768_v59  ;;  %v875_v27 = vmul.f32 %v864_v58, %v769_v60  ;;  %v1767_v57 = vld [vmem:[%s2735_s2 + $0x8] ss:$0 sm:$0xff]  ;;  %v1772_v58 = vld [vmem:[%s2735_s2 + $0xd] ss:$0 sm:$0xff] }
 0x18f   : > { %892 = vrot.lane.b32.xlu0 %v873_v23, %s1979_s29  ;;  %890 = vrot.lane.b32.xlu1 %v872_v11, %s1979_s29  ;;  %v1770_v11 = vld [vmem:[%s2735_s2 + $0xb] ss:$0 sm:$0xff]  ;;  %v1769_v23 = vld [vmem:[%s2735_s2 + $0xa] ss:$0 sm:$0xff] }
 0x190   : > { %v868_v0 = vpop.permute.xlu0 %867 }
 0x191   : > { %v876_v14 = vmul.f32 %v868_v0, %v2386_v41  ;;  %v877_v28 = vmul.f32 %v868_v0, %v2388_v42  ;;  %v1783_v0 = vld [vmem:[%s2735_s2 + $0x10] ss:$0 sm:$0xff] }
 0x193   : > { %896 = vrot.lane.b32.xlu0 %v875_v27, %s1979_s29  ;;  %894 = vrot.lane.b32.xlu1 %v874_v63, %s1979_s29  ;;  %v1773_v63 = vld [vmem:[%s2735_s2 + $0xe] ss:$0 sm:$0xff]  ;;  %v1784_v27 = vld [vmem:[%s2735_s2 + $0x11] ss:$0 sm:$0xff] }
 0x197   : > { %900 = vrot.lane.b32.xlu0 %v877_v28, %s1979_s29  ;;  %898 = vrot.lane.b32.xlu1 %v876_v14, %s1979_s29  ;;  %v1786_v14 = vld [vmem:[%s2735_s2 + $0x13] ss:$0 sm:$0xff]  ;;  %v1785_v28 = vld [vmem:[%s2735_s2 + $0x12] ss:$0 sm:$0xff]  ;;  %s1682_s29 = sshll.u32 %s2106_s13, 7 }
 0x198   : > { %s2649_s14 = scalar_lea.vmem [#allocation6], %s1682_s29 }
 0x199   : > { %s1601_s22 = sshll.u32 %s2649_s14, 4  ;;  %s2682_s22 = int_to_ptr.vmem [resolvable:$true] %s1601_s22 }
 0x19a   : > { %s1907_s11 = scalar_lea.vmem %s2682_s22, 2048 }
 0x19b   : > { %948 = vperm.xlu0 %1877, %v1748_v1   ;;  %944 = vperm.xlu1 %1878, %v1747_v2   ;;  %v1788_v1 = vld [vmem:[%s2735_s2 + $0x15] ss:$0 sm:$0xff]  ;;  %v1787_v2 = vld [vmem:[%s2735_s2 + $0x14] ss:$0 sm:$0xff]  ;;  %p1908_p11 = scmp.ne.s32.totalorder %s2682_s22, %s1907_s11 }
 0x19d   : > { %p1909_p13 = pnand %p1908_p11, %p2746_p12 }
 0x19f   : > { %956 = vperm.xlu0 %1877, %v1750_v5   ;;  %952 = vperm.xlu1 %1878, %v1749_v9   ;;  %v1790_v5 = vld [vmem:[%s2735_s2 + $0x17] ss:$0 sm:$0xff]  ;;  %v1789_v9 = vld [vmem:[%s2735_s2 + $0x16] ss:$0 sm:$0xff]  ;;  %p1910_p4 = pneg %p1909_p13 }
 0x1fd   : > { %v889_v33 = vpop.permute.xlu0 %888  ;;  %v887_v13 = vpop.permute.xlu1 %886 }
 0x1fe   : > { %v2422_v19 = vadd.f32 %v889_v33, %v822_v12  ;;  %v2424_v20 = vadd.f32 %v887_v13, %v821_v15  ;;  %v1802_v12 = vld [vmem:[%s2735_s2 + $0x1b] ss:$0 sm:$0xff]  ;;  %v1801_v15 = vld [vmem:[%s2735_s2 + $0x1a] ss:$0 sm:$0xff]  ;;  %v1804_v33 = vld [vmem:[%s2735_s2 + $0x1d] ss:$0 sm:$0xff] }
 0x1ff   : > { %v1803_v13 = vld [vmem:[%s2735_s2 + $0x1c] ss:$0 sm:$0xff] }
 0x201   : > { %v893_v37 = vpop.permute.xlu0 %892  ;;  %v891_v25 = vpop.permute.xlu1 %890 }
 0x202   : > { %v2428_v18 = vadd.f32 %v893_v37, %v824_v21  ;;  %v2430_v38 = vadd.f32 %v891_v25, %v823_v24  ;;  %v1808_v21 = vld [vmem:[%s2736_s3 + $0x1] ss:$0 sm:$0xff]  ;;  %v1807_v24 = vld [vmem:[%s2736_s3] ss:$0 sm:$0xff]  ;;  %v1810_v37 = vld [vmem:[%s2736_s3 + $0x3] ss:$0 sm:$0xff] }
 0x203   : > { %v1809_v25 = vld [vmem:[%s2736_s3 + $0x2] ss:$0 sm:$0xff] }
 0x205   : > { %v897_v46 = vpop.permute.xlu0 %896  ;;  %v895_v50 = vpop.permute.xlu1 %894 }
 0x206   : > { %v2434_v29 = vadd.f32 %v897_v46, %v826_v51  ;;  %v2436_v30 = vadd.f32 %v895_v50, %v825_v7  ;;  %v1814_v51 = vld [vmem:[%s2736_s3 + $0x7] ss:$0 sm:$0xff]  ;;  %v1813_v7 = vld [vmem:[%s2736_s3 + $0x6] ss:$0 sm:$0xff] }
 0x209   : > { %v901_v31 = vpop.permute.xlu0 %900  ;;  %v899_v56 = vpop.permute.xlu1 %898 }
 0x20a   : > { %v2438_v45 = vadd.f32 %v901_v31, %v828_v52  ;;  %v2440_v55 = vadd.f32 %v899_v56, %v827_v53  ;;  %v1755_v52 = vld [vmem:[%s2735_s2 + $0x4] ss:$0 sm:$0xff]  ;;  %v1758_v53 = vld [vmem:[%s2735_s2 + $0x7] ss:$0 sm:$0xff] }
 0x216   : > { %v945_v8 = vpop.permute.xlu1 %944  ;;  %v949_v34 = vpop.permute.xlu0 %948 }
 0x217   : > { %v959_v36 = vmul.f32 %v945_v8, %v2382_v47  ;;  %v960_v39 = vmul.f32 %v945_v8, %v2384_v61  ;;  %v961_v35 = vmul.f32 %v949_v34, %v766_v54  ;;  %v962_v40 = vmul.f32 %v949_v34, %v767_v22  ;;  %v1757_v54 = vld [vmem:[%s2735_s2 + $0x6] ss:$0 sm:$0xff]  ;;  %v1768_v22 = vld [vmem:[%s2735_s2 + $0x9] ss:$0 sm:$0xff] }
 0x219   : > { %977 = vrot.lane.b32.xlu0 %v960_v39, %s1980_s30  ;;  %975 = vrot.lane.b32.xlu1 %v959_v36, %s1980_s30 }
 0x21a   : > { %v953_v62 = vpop.permute.xlu1 %952  ;;  %v957_v44 = vpop.permute.xlu0 %956 }
 0x21b   : > { %v963_v43 = vmul.f32 %v953_v62, %v768_v59  ;;  %v964_v4 = vmul.f32 %v953_v62, %v769_v60  ;;  %v965_v47 = vmul.f32 %v957_v44, %v2386_v41  ;;  %v966_v61 = vmul.f32 %v957_v44, %v2388_v42  ;;  %v1754_v41 = vld [vmem:[%s2735_s2 + $0x3] ss:$0 sm:$0xff]  ;;  %v1753_v42 = vld [vmem:[%s2735_s2 + $0x2] ss:$0 sm:$0xff]  ;;  %v1771_v59 = vld [vmem:[%s2735_s2 + $0xc] ss:$0 sm:$0xff] }
 0x21c   : > { %v1774_v60 = vld [vmem:[%s2735_s2 + $0xf] ss:$0 sm:$0xff] }
 0x21d   : > { %981 = vrot.lane.b32.xlu0 %v962_v40, %s1980_s30  ;;  %979 = vrot.lane.b32.xlu1 %v961_v35, %s1980_s30 }
 0x221   : > { %985 = vrot.lane.b32.xlu0 %v964_v4, %s1980_s30  ;;  %983 = vrot.lane.b32.xlu1 %v963_v43, %s1980_s30 }
 0x225   : > { %989 = vrot.lane.b32.xlu0 %v966_v61, %s1980_s30  ;;  %987 = vrot.lane.b32.xlu1 %v965_v47, %s1980_s30  ;;  %s1981_s30 = smov [#allocation6]  }
 0x226   : > { %s1911_s12 = sshll.u32 %s1981_s30, 4  ;;  %s1912_s12 = int_to_ptr.vmem [resolvable:$false] %s1911_s12 }
 0x227   : > { %s1913_s23 = scalar_lea.vmem %s1912_s12, 4096  ;;  %p1914_p5 = scmp.lt.s32.totalorder %s2682_s22, %s1912_s12 }
 0x228   : > { %p1915_p7 = scmp.lt.s32.totalorder %s1913_s23, %s1907_s11 }
 0x229   : > { %1060 = vperm.xlu0 %1877, %v1752_v48   ;;  %1056 = vperm.xlu1 %1878, %v1751_v3  }
 0x22a   : > { %p1916_p8 = por %p1915_p7, %p1914_p5 }
 0x22c   : > { %p1917_p10 = pnand %p1916_p8, %p1910_p4 }
 0x22d   : > { %1068 = vperm.xlu0 %1877, %v1754_v41   ;;  %1064 = vperm.xlu1 %1878, %v1753_v42  }
 0x231   : > { %1076 = vperm.xlu0 %1877, %v1756_v49   ;;  %1072 = vperm.xlu1 %1878, %v1755_v52  }
 0x235   : > { %1084 = vperm.xlu0 %1877, %v1758_v53   ;;  %1080 = vperm.xlu1 %1878, %v1757_v54  }
 0x239   : > { %1173 = vperm.xlu0 %1877, %v1768_v22   ;;  %1169 = vperm.xlu1 %1878, %v1767_v57  }
 0x23d   : > { %1181 = vperm.xlu0 %1877, %v1770_v11   ;;  %1177 = vperm.xlu1 %1878, %v1769_v23  }
 0x241   : > { %1189 = vperm.xlu0 %1877, %v1772_v58   ;;  %1185 = vperm.xlu1 %1878, %v1771_v59  }
 0x245   : > { %1197 = vperm.xlu0 %1877, %v1774_v60   ;;  %1193 = vperm.xlu1 %1878, %v1773_v63  }
 0x249   : > { %1286 = vperm.xlu0 %1877, %v1784_v27   ;;  %1282 = vperm.xlu1 %1878, %v1783_v0  }
 0x24d   : > { %1294 = vperm.xlu0 %1877, %v1786_v14   ;;  %1290 = vperm.xlu1 %1878, %v1785_v28  }
 0x251   : > { %1302 = vperm.xlu0 %1877, %v1788_v1   ;;  %1298 = vperm.xlu1 %1878, %v1787_v2  }
 0x255   : > { %1310 = vperm.xlu0 %1877, %v1790_v5   ;;  %1306 = vperm.xlu1 %1878, %v1789_v9  }
 0x259   : > { %1399 = vperm.xlu0 %1877, %v1800_v32   ;;  %1395 = vperm.xlu1 %1878, %v1799_v10  }
 0x25d   : > { %1407 = vperm.xlu0 %1877, %v1802_v12   ;;  %1403 = vperm.xlu1 %1878, %v1801_v15  }
 0x261   : > { %1415 = vperm.xlu0 %1877, %v1804_v33   ;;  %1411 = vperm.xlu1 %1878, %v1803_v13  }
 0x265   : > { %1423 = vperm.xlu0 %1877, %v1806_v16   ;;  %1419 = vperm.xlu1 %1878, %v1805_v17  }
 0x269   : > { %1511 = vperm.xlu0 %1877, %v1808_v21   ;;  %1507 = vperm.xlu1 %1878, %v1807_v24  }
 0x26d   : > { %1519 = vperm.xlu0 %1877, %v1810_v37   ;;  %1515 = vperm.xlu1 %1878, %v1809_v25  }
 0x271   : > { %1527 = vperm.xlu0 %1877, %v1812_v26   ;;  %1523 = vperm.xlu1 %1878, %v1811_v6  }
 0x275   : > { %1535 = vperm.xlu0 %1877, %v1814_v51   ;;  %1531 = vperm.xlu1 %1878, %v1813_v7  }
 0x28b   : > { %v978_v46 = vpop.permute.xlu0 %977  ;;  %v976_v50 = vpop.permute.xlu1 %975 }
 0x28c   : > { %v2575_v31 = vadd.f32 %v978_v46, %v2422_v19  ;;  %v2578_v56 = vadd.f32 %v976_v50, %v2424_v20 }
 0x28f   : > { %v982_v8 = vpop.permute.xlu0 %981  ;;  %v980_v36 = vpop.permute.xlu1 %979 }
 0x290   : > { %v2581_v39 = vadd.f32 %v982_v8, %v2428_v18  ;;  %v2584_v34 = vadd.f32 %v980_v36, %v2430_v38 }
 0x293   : > { %v986_v35 = vpop.permute.xlu0 %985  ;;  %v984_v40 = vpop.permute.xlu1 %983 }
 0x294   : > { %v2587_v62 = vadd.f32 %v986_v35, %v2434_v29  ;;  %v2590_v43 = vadd.f32 %v984_v40, %v2436_v30 }
 0x297   : > { %v2592_v19 = vpop.permute.xlu0 %989  ;;  %v2594_v20 = vpop.permute.xlu1 %987 }
 0x2a4   : > { %v1061_v4 = vpop.permute.xlu0 %1060  ;;  %v1057_v44 = vpop.permute.xlu1 %1056 }
 0x2a5   : > { %v1089_v41 = vmul.f32 %v1061_v4, %v2578_v56  ;;  %v1090_v29 = vmul.f32 %v1061_v4, %v2575_v31  ;;  %v1087_v42 = vmul.f32 %v1057_v44, %v2578_v56  ;;  %v1088_v30 = vmul.f32 %v1057_v44, %v2575_v31 }
 0x2a8   : > { %v1069_v47 = vpop.permute.xlu0 %1068  ;;  %v1065_v18 = vpop.permute.xlu1 %1064 }
 0x2a9   : > { %v1093_v60 = vmul.f32 %v1069_v47, %v2578_v56  ;;  %v1094_v63 = vmul.f32 %v1069_v47, %v2575_v31  ;;  %v1091_v27 = vmul.f32 %v1065_v18, %v2578_v56  ;;  %v1092_v0 = vmul.f32 %v1065_v18, %v2575_v31 }
 0x2ac   : > { %v1077_v61 = vpop.permute.xlu0 %1076  ;;  %v1073_v48 = vpop.permute.xlu1 %1072 }
 0x2ad   : > { %v1097_v33 = vmul.f32 %v1077_v61, %v2578_v56  ;;  %v1098_v13 = vmul.f32 %v1077_v61, %v2575_v31  ;;  %v1095_v16 = vmul.f32 %v1073_v48, %v2578_v56  ;;  %v1096_v17 = vmul.f32 %v1073_v48, %v2575_v31 }
 0x2b0   : > { %v1085_v38 = vpop.permute.xlu0 %1084  ;;  %v1081_v3 = vpop.permute.xlu1 %1080 }
 0x2b1   : > { %v1101_v8 = vmul.f32 %v1085_v38, %v2578_v56  ;;  %v1102_v36 = vmul.f32 %v1085_v38, %v2575_v31  ;;  %v1099_v35 = vmul.f32 %v1081_v3, %v2578_v56  ;;  %v1100_v40 = vmul.f32 %v1081_v3, %v2575_v31 }
 0x2b4   : > { %v1174_v49 = vpop.permute.xlu0 %1173  ;;  %v1170_v52 = vpop.permute.xlu1 %1169 }
 0x2b5   : > { %v1202_v53 = vmul.f32 %v1174_v49, %v2584_v34  ;;  %v1203_v54 = vmul.f32 %v1174_v49, %v2581_v39  ;;  %v1200_v22 = vmul.f32 %v1170_v52, %v2584_v34  ;;  %v1201_v57 = vmul.f32 %v1170_v52, %v2581_v39 }
 0x2b7   : > { %v1218_v11 = vadd.f32 %v1202_v53, %v1089_v41  ;;  %v1219_v23 = vadd.f32 %v1203_v54, %v1090_v29  ;;  %v1216_v58 = vadd.f32 %v1200_v22, %v1087_v42  ;;  %v1217_v59 = vadd.f32 %v1201_v57, %v1088_v30 }
 0x2b8   : > { %v1182_v14 = vpop.permute.xlu0 %1181  ;;  %v1178_v28 = vpop.permute.xlu1 %1177 }
 0x2b9   : > { %v1206_v1 = vmul.f32 %v1182_v14, %v2584_v34  ;;  %v1207_v2 = vmul.f32 %v1182_v14, %v2581_v39  ;;  %v1204_v5 = vmul.f32 %v1178_v28, %v2584_v34  ;;  %v1205_v9 = vmul.f32 %v1178_v28, %v2581_v39 }
 0x2bb   : > { %v1222_v32 = vadd.f32 %v1206_v1, %v1093_v60  ;;  %v1223_v10 = vadd.f32 %v1207_v2, %v1094_v63  ;;  %v1220_v12 = vadd.f32 %v1204_v5, %v1091_v27  ;;  %v1221_v15 = vadd.f32 %v1205_v9, %v1092_v0 }
 0x2bc   : > { %v1190_v21 = vpop.permute.xlu0 %1189  ;;  %v1186_v24 = vpop.permute.xlu1 %1185 }
 0x2bd   : > { %v1210_v37 = vmul.f32 %v1190_v21, %v2584_v34  ;;  %v1211_v25 = vmul.f32 %v1190_v21, %v2581_v39  ;;  %v1208_v26 = vmul.f32 %v1186_v24, %v2584_v34  ;;  %v1209_v6 = vmul.f32 %v1186_v24, %v2581_v39 }
 0x2bf   : > { %v1226_v51 = vadd.f32 %v1210_v37, %v1097_v33  ;;  %v1227_v7 = vadd.f32 %v1211_v25, %v1098_v13  ;;  %v1224_v46 = vadd.f32 %v1208_v26, %v1095_v16  ;;  %v1225_v50 = vadd.f32 %v1209_v6, %v1096_v17 }
 0x2c0   : > { %v1198_v4 = vpop.permute.xlu0 %1197  ;;  %v1194_v44 = vpop.permute.xlu1 %1193  ;;  %v1006_v37 = vadd.f32 %v2592_v19, %v2438_v45  ;;  %v1005_v25 = vadd.f32 %v2594_v20, %v2440_v55 }
 0x2c1   : > { %v1214_v47 = vmul.f32 %v1198_v4, %v2584_v34  ;;  %v1215_v18 = vmul.f32 %v1198_v4, %v2581_v39  ;;  %v1212_v61 = vmul.f32 %v1194_v44, %v2584_v34  ;;  %v1213_v48 = vmul.f32 %v1194_v44, %v2581_v39 }
 0x2c3   : > { %v1230_v41 = vadd.f32 %v1214_v47, %v1101_v8  ;;  %v1231_v29 = vadd.f32 %v1215_v18, %v1102_v36  ;;  %v1228_v42 = vadd.f32 %v1212_v61, %v1099_v35  ;;  %v1229_v30 = vadd.f32 %v1213_v48, %v1100_v40 }
 0x2c4   : > { %v1287_v49 = vpop.permute.xlu0 %1286  ;;  %v1283_v38 = vpop.permute.xlu1 %1282 }
 0x2c5   : > { %v1315_v56 = vmul.f32 %v1287_v49, %v2590_v43  ;;  %v1316_v31 = vmul.f32 %v1287_v49, %v2587_v62  ;;  %v1313_v3 = vmul.f32 %v1283_v38, %v2590_v43  ;;  %v1314_v52 = vmul.f32 %v1283_v38, %v2587_v62 }
 0x2c7   : > { %v1331_v53 = vadd.f32 %v1315_v56, %v1218_v11  ;;  %v1332_v54 = vadd.f32 %v1316_v31, %v1219_v23  ;;  %v1329_v22 = vadd.f32 %v1313_v3, %v1216_v58  ;;  %v1330_v34 = vadd.f32 %v1314_v52, %v1217_v59 }
 0x2c8   : > { %v1295_v57 = vpop.permute.xlu0 %1294  ;;  %v1291_v39 = vpop.permute.xlu1 %1290 }
 0x2c9   : > { %v1319_v60 = vmul.f32 %v1295_v57, %v2590_v43  ;;  %v1320_v63 = vmul.f32 %v1295_v57, %v2587_v62  ;;  %v1317_v27 = vmul.f32 %v1291_v39, %v2590_v43  ;;  %v1318_v0 = vmul.f32 %v1291_v39, %v2587_v62 }
 0x2cb   : > { %v1335_v14 = vadd.f32 %v1319_v60, %v1222_v32  ;;  %v1336_v28 = vadd.f32 %v1320_v63, %v1223_v10  ;;  %v1333_v1 = vadd.f32 %v1317_v27, %v1220_v12  ;;  %v1334_v2 = vadd.f32 %v1318_v0, %v1221_v15 }
 0x2cc   : > { %v1303_v5 = vpop.permute.xlu0 %1302  ;;  %v1299_v9 = vpop.permute.xlu1 %1298 }
 0x2cd   : > { %v1323_v11 = vmul.f32 %v1303_v5, %v2590_v43  ;;  %v1324_v23 = vmul.f32 %v1303_v5, %v2587_v62  ;;  %v1321_v58 = vmul.f32 %v1299_v9, %v2590_v43  ;;  %v1322_v59 = vmul.f32 %v1299_v9, %v2587_v62 }
 0x2cf   : > { %v1339_v33 = vadd.f32 %v1323_v11, %v1226_v51  ;;  %v1340_v13 = vadd.f32 %v1324_v23, %v1227_v7  ;;  %v1337_v16 = vadd.f32 %v1321_v58, %v1224_v46  ;;  %v1338_v17 = vadd.f32 %v1322_v59, %v1225_v50 }
 0x2d0   : > { %v1311_v21 = vpop.permute.xlu0 %1310  ;;  %v1307_v24 = vpop.permute.xlu1 %1306 }
 0x2d1   : > { %v1327_v32 = vmul.f32 %v1311_v21, %v2590_v43  ;;  %v1328_v10 = vmul.f32 %v1311_v21, %v2587_v62  ;;  %v1325_v12 = vmul.f32 %v1307_v24, %v2590_v43  ;;  %v1326_v15 = vmul.f32 %v1307_v24, %v2587_v62 }
 0x2d3   : > { %v1343_v26 = vadd.f32 %v1327_v32, %v1230_v41  ;;  %v1344_v6 = vadd.f32 %v1328_v10, %v1231_v29  ;;  %v1341_v51 = vadd.f32 %v1325_v12, %v1228_v42  ;;  %v1342_v7 = vadd.f32 %v1326_v15, %v1229_v30 }
 0x2d4   : > { %v1400_v46 = vpop.permute.xlu0 %1399  ;;  %v1396_v50 = vpop.permute.xlu1 %1395 }
 0x2d5   : > { %v1428_v8 = vmul.f32 %v1400_v46, %v1005_v25  ;;  %v1429_v36 = vmul.f32 %v1400_v46, %v1006_v37  ;;  %v1426_v35 = vmul.f32 %v1396_v50, %v1005_v25  ;;  %v1427_v40 = vmul.f32 %v1396_v50, %v1006_v37 }
 0x2d7   : > { %v1445_v4 = vadd.f32 %v1429_v36, %v1332_v54  ;;  %v1444_v43 = vadd.f32 %v1428_v8, %v1331_v53  ;;  %v1443_v44 = vadd.f32 %v1427_v40, %v1330_v34  ;;  %v1442_v62 = vadd.f32 %v1426_v35, %v1329_v22 }
 0x2d8   : > { %v1408_v47 = vpop.permute.xlu0 %1407  ;;  %v1404_v18 = vpop.permute.xlu1 %1403 }
 0x2d9   : > { %v1432_v45 = vmul.f32 %v1408_v47, %v1005_v25  ;;  %v1433_v19 = vmul.f32 %v1408_v47, %v1006_v37  ;;  %v1430_v61 = vmul.f32 %v1404_v18, %v1005_v25  ;;  %v1431_v55 = vmul.f32 %v1404_v18, %v1006_v37 }
 0x2db   : > { %v1449_v20 = vadd.f32 %v1433_v19, %v1336_v28  ;;  %v1448_v48 = vadd.f32 %v1432_v45, %v1335_v14  ;;  %v1447_v41 = vadd.f32 %v1431_v55, %v1334_v2  ;;  %v1446_v29 = vadd.f32 %v1430_v61, %v1333_v1 }
 0x2dc   : > { %v1416_v42 = vpop.permute.xlu0 %1415  ;;  %v1412_v30 = vpop.permute.xlu1 %1411 }
 0x2dd   : > { %v1436_v49 = vmul.f32 %v1416_v42, %v1005_v25  ;;  %v1437_v38 = vmul.f32 %v1416_v42, %v1006_v37  ;;  %v1434_v56 = vmul.f32 %v1412_v30, %v1005_v25  ;;  %v1435_v31 = vmul.f32 %v1412_v30, %v1006_v37 }
 0x2df   : > { %v1453_v3 = vadd.f32 %v1437_v38, %v1340_v13  ;;  %v1452_v52 = vadd.f32 %v1436_v49, %v1339_v33  ;;  %v1451_v53 = vadd.f32 %v1435_v31, %v1338_v17  ;;  %v1450_v54 = vadd.f32 %v1434_v56, %v1337_v16 }
 0x2e0   : > { %v1424_v22 = vpop.permute.xlu0 %1423  ;;  %v1420_v34 = vpop.permute.xlu1 %1419 }
 0x2e1   : > { %v1440_v57 = vmul.f32 %v1424_v22, %v1005_v25  ;;  %v1441_v39 = vmul.f32 %v1424_v22, %v1006_v37  ;;  %v1438_v60 = vmul.f32 %v1420_v34, %v1005_v25  ;;  %v1439_v63 = vmul.f32 %v1420_v34, %v1006_v37 }
 0x2e3   : > { %v1457_v27 = vadd.f32 %v1441_v39, %v1344_v6  ;;  %v1456_v0 = vadd.f32 %v1440_v57, %v1343_v26  ;;  %v1455_v14 = vadd.f32 %v1439_v63, %v1342_v7  ;;  %v1454_v28 = vadd.f32 %v1438_v60, %v1341_v51 }
 0x2e4   : > { %v1512_v1 = vpop.permute.xlu0 %1511  ;;  %v1508_v2 = vpop.permute.xlu1 %1507 }
 0x2e5   : > { %v1540_v5 = vadd.f32 %v1512_v1, %v1444_v43  ;;  %v1541_v9 = vadd.f32 %v1512_v1, %v1445_v4  ;;  %v1538_v11 = vadd.f32 %v1508_v2, %v1442_v62  ;;  %v1539_v23 = vadd.f32 %v1508_v2, %v1443_v44 }
 0x2e7   : > { %v1556_v58 = vmax.f32 %v1540_v5, 0.0  ;;  %v1557_v59 = vmax.f32 %v1541_v9, 0.0  ;;  %v1554_v33 = vmax.f32 %v1538_v11, 0.0  ;;  %v1555_v13 = vmax.f32 %v1539_v23, 0.0 }
 0x2e8   : > { %v1520_v16 = vpop.permute.xlu0 %1519  ;;  %v1516_v17 = vpop.permute.xlu1 %1515 }
 0x2e9   : > { %1573 = vst.msk [vmem:[%s2649_s14 + $0x10] sm:$0xff] %vm1570_vm3, %v1556_v58  ;;  %1574 = vst.msk [vmem:[%s2649_s14 + $0x18] sm:$0xff] %vm1570_vm3, %v1557_v59  ;;  %v1544_v21 = vadd.f32 %v1520_v16, %v1448_v48  ;;  %v1545_v24 = vadd.f32 %v1520_v16, %v1449_v20  ;;  %v1542_v32 = vadd.f32 %v1516_v17, %v1446_v29 }
 0x2ea   : > { %1571 = vst.msk [vmem:[%s2649_s14] sm:$0xff] %vm1570_vm3, %v1554_v33  ;;  %1572 = vst.msk [vmem:[%s2649_s14 + $0x8] sm:$0xff] %vm1570_vm3, %v1555_v13  ;;  %v1543_v10 = vadd.f32 %v1516_v17, %v1447_v41 }
 0x2eb   : > { %v1560_v12 = vmax.f32 %v1544_v21, 0.0  ;;  %v1561_v15 = vmax.f32 %v1545_v24, 0.0  ;;  %v1558_v37 = vmax.f32 %v1542_v32, 0.0 }
 0x2ec   : > { %v1559_v25 = vmax.f32 %v1543_v10, 0.0  ;;  %v1528_v26 = vpop.permute.xlu0 %1527  ;;  %v1524_v6 = vpop.permute.xlu1 %1523 }
 0x2ed   : > { %1577 = vst.msk [vmem:[%s2649_s14 + $0x30] sm:$0xff] %vm1570_vm3, %v1560_v12  ;;  %1578 = vst.msk [vmem:[%s2649_s14 + $0x38] sm:$0xff] %vm1570_vm3, %v1561_v15  ;;  %v1548_v51 = vadd.f32 %v1528_v26, %v1452_v52  ;;  %v1549_v7 = vadd.f32 %v1528_v26, %v1453_v3  ;;  %v1546_v46 = vadd.f32 %v1524_v6, %v1450_v54 }
 0x2ee   : > { %1575 = vst.msk [vmem:[%s2649_s14 + $0x20] sm:$0xff] %vm1570_vm3, %v1558_v37  ;;  %1576 = vst.msk [vmem:[%s2649_s14 + $0x28] sm:$0xff] %vm1570_vm3, %v1559_v25  ;;  %v1547_v50 = vadd.f32 %v1524_v6, %v1451_v53 }
 0x2ef   : > { %v1564_v8 = vmax.f32 %v1548_v51, 0.0  ;;  %v1565_v36 = vmax.f32 %v1549_v7, 0.0  ;;  %v1562_v35 = vmax.f32 %v1546_v46, 0.0 }
 0x2f0   : > { %v1563_v40 = vmax.f32 %v1547_v50, 0.0  ;;  %v1536_v4 = vpop.permute.xlu0 %1535  ;;  %v1532_v43 = vpop.permute.xlu1 %1531 }
 0x2f1   : > { %1581 = vst.msk [vmem:[%s2649_s14 + $0x50] sm:$0xff] %vm1570_vm3, %v1564_v8  ;;  %1582 = vst.msk [vmem:[%s2649_s14 + $0x58] sm:$0xff] %vm1570_vm3, %v1565_v36  ;;  %v1552_v44 = vadd.f32 %v1536_v4, %v1456_v0  ;;  %v1553_v62 = vadd.f32 %v1536_v4, %v1457_v27  ;;  %v1550_v47 = vadd.f32 %v1532_v43, %v1454_v28 }
 0x2f2   : > { %1579 = vst.msk [vmem:[%s2649_s14 + $0x40] sm:$0xff] %vm1570_vm3, %v1562_v35  ;;  %1580 = vst.msk [vmem:[%s2649_s14 + $0x48] sm:$0xff] %vm1570_vm3, %v1563_v40  ;;  %v1551_v18 = vadd.f32 %v1532_v43, %v1455_v14 }
 0x2f3   : > { %v1568_v45 = vmax.f32 %v1552_v44, 0.0  ;;  %v1569_v19 = vmax.f32 %v1553_v62, 0.0  ;;  %v1566_v61 = vmax.f32 %v1550_v47, 0.0 }
 0x2f4   : > { %v1567_v55 = vmax.f32 %v1551_v18, 0.0 }
 0x2f5   : > { %1585 = vst.msk [vmem:[%s2649_s14 + $0x70] sm:$0xff] %vm1570_vm3, %v1568_v45  ;;  %1586 = vst.msk [vmem:[%s2649_s14 + $0x78] sm:$0xff] %vm1570_vm3, %v1569_v19 }
 0x2f6   : > { %1583 = vst.msk [vmem:[%s2649_s14 + $0x60] sm:$0xff] %vm1570_vm3, %v1566_v61  ;;  %1584 = vst.msk [vmem:[%s2649_s14 + $0x68] sm:$0xff] %vm1570_vm3, %v1567_v55 }
 0x2f7   : > { %1920 = shalt.err (!%p1917_p10)
}
 0x2f8   : > { %s1921_s25 = scalar_lea.hbm %s2680_s8, 2048  ;;  %s1925_s7 = scalar_lea.hbm %s2737_s4, 4096 }
 0x2f9   : > { %p1922_p0 = scmp.ne.s32.totalorder %s2680_s8, %s1921_s25  ;;  %p1926_p1 = scmp.lt.s32.totalorder %s2680_s8, %s2737_s4 }
 0x2fa   : > { %p1927_p3 = scmp.lt.s32.totalorder %s1925_s7, %s1921_s25 }
 0x2fb   : > { %p1923_p2 = pnand %p1922_p0, %p2746_p12 }
 0x2fc   : > { %p1928_p6 = por %p1927_p3, %p1926_p1 }
 0x2fd   : > { %p1924_p9 = pneg %p1923_p2 }
 0x2ff   : > { %p1929_p11 = pnand %p1928_p6, %p1924_p9 }
 0x301   : > { %1932 = shalt.err (!%p1929_p11)
}
 0x302   : > { %s1982_s14 = smov 128   ;;  %s1983_s20 = smov 8  }
 0x303   : > { %1824 = dma.vmem_to_hbm [thread:$0]  (%p2746_p12), %s2682_s22, 2048, %s2680_s8, %s1588_s10, %s1982_s14, %s1982_s14, %s1983_s20  }
 0x304 PF: > { %s1616_s19 = sand.u32 1, %s1959_s15   ;;  %p2747_p13 = scmp.ne.s32.totalorder %s2743_s28, 0 }
 0x305   : > { %p2748_p4 = scmp.ge.s32.totalorder %s1971_s18, 2  ;;  %s1617_s26 = scalar_lea.sflag [#allocation5], %s1616_s19 }
 0x307   : > { %p1831_p5 = pnand %p2748_p4, %p2747_p13 }
 0x309   : > { %p1832_p7 = pneg %p1831_p5 }
 0x30b   : > { %1954 = dma.done.wait (%p1832_p7), %s1617_s26, 2048  }
 0x30c   : > { %1956 = vsyncadd (%p1832_p7), %s1617_s26, 4294965248  ;;  %p17_p8 = scmp.ge.s32.totalorder %s2034_s21, 4   ;;  %s2749_s15 = smov %s1963_s16 }
 0x30d   : > { %s2750_s16 = smov %s1967_s17  ;;  %s2751_s17 = smov %s2046_s24 }
 0x30e   : > { %s2752_s18 = smov %s2034_s21  ;;  %19 = sbr.rel (!%p17_p8) target bundleno = 5 (0x5), region = 92 }
 0x313   :  { %1622 = vsyncpa [#allocation4], 1 }
 0x314   :  { %1624 = vsyncpa [#allocation4 + $0x1], 1 }
 0x315   :  { %1625 = vsyncpa [#allocation5], 1 }
 0x316   :  { %1627 = vsyncpa [#allocation5 + $0x1], 1 }

</bundles_post_ra>
